<compile_context>
chip_gen: v6e
topology: v6e:2x2x1
jax: 0.10.0
libtpu: 0.0.40
codegen_flags: <defaults>
</compile_context>

<pallas_src>
import jax
import jax.numpy as jnp
from jax import lax
from jax.experimental import pallas as pl
from jax.experimental.pallas import tpu as pltpu

EMBED_DIMENSION = 128
EMBED_MAX_NORM = 1.0


def _round_up(x, m):
    return (x + m - 1) // m * m


# ---------------------------------------------------------------------------
# Fused kernel: HBM row gather + vectorized max_norm renorm + vocab-tiled linear
# ---------------------------------------------------------------------------
def skipgram_kernel(idx_ref, table_ref, w_ref, b_ref, o_ref, act_ref, buf_ref, sem):
    # idx_ref  : SMEM (N_pad,) int32        -- scalar-prefetched, clamped token ids
    # table_ref: HBM  (V, D) f32  (pl.ANY)  -- embedding table (row-gathered only)
    # w_ref    : VMEM (D, tv) bf16          -- streamed linear-weight tile
    # b_ref    : VMEM (1, tv) f32           -- bias tile
    # o_ref    : VMEM (tn, tv) f32          -- logits tile
    # act_ref  : VMEM (n_n, tn, D) bf16     -- persistent renormed activations
    # buf_ref  : VMEM (tn, D) f32           -- DMA landing buffer
    # sem      : DMA semaphore shared by all row copies
    j = pl.program_id(0)  # vocab tile (outer)
    i = pl.program_id(1)  # token tile (inner)
    tn = buf_ref.shape[0]

    # ---- phase A: gather + renorm, once per token tile (first vocab tile) ----
    @pl.when(j == 0)
    def _():
        base = i * tn
        # Build all row-copy descriptors first (all idx SMEM reads happen before
        # any .wait()), then issue-all / wait-all so the tiny 512 B row DMAs
        # overlap instead of serializing.
        copies = [
            pltpu.make_async_copy(
                table_ref.at[pl.ds(idx_ref[base + r], 1), :],
                buf_ref.at[pl.ds(r, 1), :],
                sem,
            )
            for r in range(tn)
        ]
        for c in copies:
            c.start()
        for c in copies:
            c.wait()

        # Vectorized renorm: one XLU reduce + EUP rsqrt, full-vreg stores.
        g = buf_ref[...]
        sumsq = jnp.sum(g * g, axis=-1, keepdims=True)
        scale = jnp.where(
            sumsq > jnp.float32(EMBED_MAX_NORM * EMBED_MAX_NORM),
            jnp.float32(EMBED_MAX_NORM) * lax.rsqrt(sumsq),
            jnp.float32(1.0),
        )
        act_ref[i] = (g * scale).astype(jnp.bfloat16)

    # ---- phase B: (tn, D) @ (D, tv) on the MXU, f32 accumulate + bias --------
    x = act_ref[i]  # bf16
    o_ref[...] = (
        jnp.dot(x, w_ref[...], preferred_element_type=jnp.float32) + b_ref[...]
    )


# ---------------------------------------------------------------------------
# Wrapper
# ---------------------------------------------------------------------------
def skipgram_forward(indices, emb_table, w_t, bias):
    """SkipGram forward: logits = Linear(Embedding_with_max_norm(indices)).

    indices  : (B, S) int
    emb_table: (V, D) f32   -- nn.Embedding weight
    w_t      : (D, V) f32   -- nn.Linear weight, transposed (PyTorch stores (V, D))
    bias     : (V,)  f32    -- nn.Linear bias
    returns  : (B, S, V) f32
    """
    B, S = indices.shape
    V, D = emb_table.shape
    assert w_t.shape == (D, V)
    assert bias.shape == (V,)
    assert D == EMBED_DIMENSION and D % 128 == 0

    N = B * S

    # Token-axis tiling: single tile while N_pad <= 128, else 128-row tiles.
    N_pad = _round_up(max(N, 8), 8)
    if N_pad > 128:
        N_pad = _round_up(N_pad, 128)
        tn = 128
    else:
        tn = N_pad
    n_n = N_pad // tn

    # Vocab tiling: prefer a large (>=1024) divisor of the 128-rounded vocab so
    # V_pad == V and the wrapper slice is a no-op; otherwise pad to 2048-wide tiles.
    V_pad = _round_up(V, 128)
    tv = None
    for cand in range(min(2048, V_pad), 1023, -128):
        if V_pad % cand == 0:
            tv = cand
            break
    if tv is None:
        tv = min(2048, V_pad)
        V_pad = _round_up(V_pad, tv)
    n_v = V_pad // tv

    # Clamp ids (HBM OOB is not runtime-checked) and pad with 0.
    idx = jnp.clip(indices.reshape(-1).astype(jnp.int32), 0, V - 1)
    if N_pad != N:
        idx = jnp.pad(idx, (0, N_pad - N))

    table = emb_table.astype(jnp.float32)
    w_pad = w_t.astype(jnp.bfloat16)
    b_pad = bias.astype(jnp.float32)
    if V_pad != V:
        w_pad = jnp.pad(w_pad, ((0, 0), (0, V_pad - V)))
        b_pad = jnp.pad(b_pad, (0, V_pad - V))
    b_pad = b_pad.reshape(1, V_pad)

    # Rough VMEM estimate (double-buffered W/bias/out + persistent scratch); only
    # raise the scoped limit when the 16 MiB v5e default could be exceeded.
    vmem_est = (
        2 * D * tv * 2        # W tiles (bf16, double-buffered)
        + 2 * tv * 4          # bias tiles
        + 2 * tn * tv * 4     # output tiles (f32, double-buffered)
        + n_n * tn * D * 2    # persistent bf16 activations
        + tn * D * 4          # DMA landing buffer
    )
    cp_kwargs = {}
    if vmem_est > 12 * 1024 * 1024:
        cp_kwargs["vmem_limit_bytes"] = min(int(vmem_est * 2), 64 * 1024 * 1024)

    logits = pl.pallas_call(
        skipgram_kernel,
        out_shape=jax.ShapeDtypeStruct((N_pad, V_pad), jnp.float32),
        grid_spec=pltpu.PrefetchScalarGridSpec(
            num_scalar_prefetch=1,
            grid=(n_v, n_n),  # vocab OUTER -> each W tile fetched exactly once
            in_specs=[
                pl.BlockSpec(memory_space=pl.ANY),                 # table in HBM
                pl.BlockSpec((D, tv), lambda j, i, idx_sm: (0, j)),  # W tile
                pl.BlockSpec((1, tv), lambda j, i, idx_sm: (0, j)),  # bias tile
            ],
            out_specs=pl.BlockSpec((tn, tv), lambda j, i, idx_sm: (i, j)),
            scratch_shapes=[
                pltpu.VMEM((n_n, tn, D), jnp.bfloat16),  # persistent activations
                pltpu.VMEM((tn, D), jnp.float32),        # DMA landing buffer
                pltpu.SemaphoreType.DMA,                 # shared row-DMA semaphore
            ],
        ),
        compiler_params=pltpu.CompilerParams(
            # Vocab axis carries the gather->use dependence on act_ref, so it must
            # be "arbitrary"; token axis kept "arbitrary" as well for safety.
            dimension_semantics=("arbitrary", "arbitrary"),
            **cp_kwargs,
        ),
    )(idx, table, w_pad, b_pad)

    if N_pad != N or V_pad != V:
        logits = logits[:N, :V]
    return logits.reshape(B, S, V)


def skipgram_reference(indices, emb_table, w_t, bias):
    x = emb_table[indices].astype(jnp.float32)                       # (B, S, D)
    norm = jnp.sqrt(jnp.sum(x * x, axis=-1, keepdims=True))
    scale = jnp.where(norm > EMBED_MAX_NORM,
                      EMBED_MAX_NORM / (norm + 1e-7), 1.0)
    x = x * scale
    return x @ w_t.astype(jnp.float32) + bias[None, None, :]


if __name__ == "__main__":
    vocab_size = 2048
    D = EMBED_DIMENSION
    B, S = 2, 8

    key = jax.random.PRNGKey(0)
    k_emb, k_w, k_b, k_idx = jax.random.split(key, 4)

    # Deterministic synthetic parameters (nn.Embedding(V, D), nn.Linear(D, V)).
    emb_table = jax.random.normal(k_emb, (vocab_size, D), dtype=jnp.float32)
    w = jax.random.normal(k_w, (vocab_size, D), dtype=jnp.float32) * 0.05  # (out, in)
    bias = jax.random.normal(k_b, (vocab_size,), dtype=jnp.float32) * 0.01
    w_t = w.T                                                              # (D, V)

    indices = jax.random.randint(k_idx, (B, S), 0, vocab_size, dtype=jnp.int32)

    out = skipgram_forward(indices, emb_table, w_t, bias)
    out = jax.block_until_ready(out)

    ref = skipgram_reference(indices, emb_table, w_t, bias)
    assert out.shape == (B, S, vocab_size)
    # Activations and weights go through bf16 on the MXU (f32 accumulation);
    # compare to the f32 reference with a tolerance covering bf16 quantization.
    max_err = float(jnp.max(jnp.abs(out - ref)))
    assert jnp.allclose(out, ref, atol=1e-2, rtol=1e-2), f"mismatch, max_err={max_err}"

    print("KERNEL_OK")
</pallas_src>

<mosaic_0001>
module attributes {stable_mosaic.version = 11 : i64} {
  func.func @skipgram_kernel(%arg0: i32, %arg1: i32, %arg2: memref<16xi32, #tpu.memory_space<smem>>, %arg3: memref<2048x128xf32, #tpu.memory_space<any>>, %arg4: memref<128x2048xbf16, #tpu.memory_space<vmem>>, %arg5: memref<1x2048xf32, #tpu.memory_space<vmem>>, %arg6: memref<16x2048xf32, #tpu.memory_space<vmem>>, %arg7: memref<1x16x128xbf16, #tpu.memory_space<vmem>>, %arg8: memref<16x128xf32, #tpu.memory_space<vmem>>, %arg9: memref<!tpu.dma_semaphore, #tpu.memory_space<semaphore_mem>>) attributes {dimension_semantics = [#tpu.dimension_semantics<arbitrary>, #tpu.dimension_semantics<arbitrary>], iteration_bounds = array<i64: 1, 1>, scalar_prefetch = 1 : i64, scratch_operands = 3 : i64, tpu.core_type = #tpu.core_type<tc>, window_params = [{}, {transform_indices = @transform_1, window_bounds = array<i64: 128, 2048>}, {transform_indices = @transform_2, window_bounds = array<i64: 1, 2048>}, {transform_indices = @transform_3, window_bounds = array<i64: 16, 2048>}]} {
    %c0_i32 = arith.constant 0 : i32
    %0 = arith.cmpi eq, %arg0, %c0_i32 : i32
    %1 = arith.extui %0 : i1 to i32
    %c0_i32_0 = arith.constant 0 : i32
    %2 = arith.cmpi ne, %1, %c0_i32_0 : i32
    scf.if %2 {
      %c16_i32 = arith.constant 16 : i32
      %12 = arith.muli %arg1, %c16_i32 : i32
      %c0_i32_8 = arith.constant 0 : i32
      %13 = arith.addi %12, %c0_i32_8 : i32
      %14 = arith.index_cast %13 : i32 to index
      %15 = memref.load %arg2[%14] : memref<16xi32, #tpu.memory_space<smem>>
      %c1_i32 = arith.constant 1 : i32
      %16 = arith.addi %12, %c1_i32 : i32
      %17 = arith.index_cast %16 : i32 to index
      %18 = memref.load %arg2[%17] : memref<16xi32, #tpu.memory_space<smem>>
      %c2_i32 = arith.constant 2 : i32
      %19 = arith.addi %12, %c2_i32 : i32
      %20 = arith.index_cast %19 : i32 to index
      %21 = memref.load %arg2[%20] : memref<16xi32, #tpu.memory_space<smem>>
      %c3_i32 = arith.constant 3 : i32
      %22 = arith.addi %12, %c3_i32 : i32
      %23 = arith.index_cast %22 : i32 to index
      %24 = memref.load %arg2[%23] : memref<16xi32, #tpu.memory_space<smem>>
      %c4_i32 = arith.constant 4 : i32
      %25 = arith.addi %12, %c4_i32 : i32
      %26 = arith.index_cast %25 : i32 to index
      %27 = memref.load %arg2[%26] : memref<16xi32, #tpu.memory_space<smem>>
      %c5_i32 = arith.constant 5 : i32
      %28 = arith.addi %12, %c5_i32 : i32
      %29 = arith.index_cast %28 : i32 to index
      %30 = memref.load %arg2[%29] : memref<16xi32, #tpu.memory_space<smem>>
      %c6_i32 = arith.constant 6 : i32
      %31 = arith.addi %12, %c6_i32 : i32
      %32 = arith.index_cast %31 : i32 to index
      %33 = memref.load %arg2[%32] : memref<16xi32, #tpu.memory_space<smem>>
      %c7_i32 = arith.constant 7 : i32
      %34 = arith.addi %12, %c7_i32 : i32
      %35 = arith.index_cast %34 : i32 to index
      %36 = memref.load %arg2[%35] : memref<16xi32, #tpu.memory_space<smem>>
      %c8_i32 = arith.constant 8 : i32
      %37 = arith.addi %12, %c8_i32 : i32
      %38 = arith.index_cast %37 : i32 to index
      %39 = memref.load %arg2[%38] : memref<16xi32, #tpu.memory_space<smem>>
      %c9_i32 = arith.constant 9 : i32
      %40 = arith.addi %12, %c9_i32 : i32
      %41 = arith.index_cast %40 : i32 to index
      %42 = memref.load %arg2[%41] : memref<16xi32, #tpu.memory_space<smem>>
      %c10_i32 = arith.constant 10 : i32
      %43 = arith.addi %12, %c10_i32 : i32
      %44 = arith.index_cast %43 : i32 to index
      %45 = memref.load %arg2[%44] : memref<16xi32, #tpu.memory_space<smem>>
      %c11_i32 = arith.constant 11 : i32
      %46 = arith.addi %12, %c11_i32 : i32
      %47 = arith.index_cast %46 : i32 to index
      %48 = memref.load %arg2[%47] : memref<16xi32, #tpu.memory_space<smem>>
      %c12_i32 = arith.constant 12 : i32
      %49 = arith.addi %12, %c12_i32 : i32
      %50 = arith.index_cast %49 : i32 to index
      %51 = memref.load %arg2[%50] : memref<16xi32, #tpu.memory_space<smem>>
      %c13_i32 = arith.constant 13 : i32
      %52 = arith.addi %12, %c13_i32 : i32
      %53 = arith.index_cast %52 : i32 to index
      %54 = memref.load %arg2[%53] : memref<16xi32, #tpu.memory_space<smem>>
      %c14_i32 = arith.constant 14 : i32
      %55 = arith.addi %12, %c14_i32 : i32
      %56 = arith.index_cast %55 : i32 to index
      %57 = memref.load %arg2[%56] : memref<16xi32, #tpu.memory_space<smem>>
      %c15_i32 = arith.constant 15 : i32
      %58 = arith.addi %12, %c15_i32 : i32
      %59 = arith.index_cast %58 : i32 to index
      %60 = memref.load %arg2[%59] : memref<16xi32, #tpu.memory_space<smem>>
      %c0_i32_9 = arith.constant 0 : i32
      %61 = tpu.memref_slice %arg3[%15, %c0_i32_9] : memref<2048x128xf32, #tpu.memory_space<any>> -> memref<1x128xf32, #tpu.memory_space<any>>
      %c0_i32_10 = arith.constant 0 : i32
      %c0_i32_11 = arith.constant 0 : i32
      %62 = tpu.memref_slice %arg8[%c0_i32_10, %c0_i32_11] : memref<16x128xf32, #tpu.memory_space<vmem>> -> memref<1x128xf32, #tpu.memory_space<vmem>>
      tpu.enqueue_dma source(%61 : memref<1x128xf32, #tpu.memory_space<any>>) target(%62 : memref<1x128xf32, #tpu.memory_space<vmem>>) target_semaphore(%arg9 : memref<!tpu.dma_semaphore, #tpu.memory_space<semaphore_mem>>)
      %c0_i32_12 = arith.constant 0 : i32
      %63 = tpu.memref_slice %arg3[%18, %c0_i32_12] : memref<2048x128xf32, #tpu.memory_space<any>> -> memref<1x128xf32, #tpu.memory_space<any>>
      %c1_i32_13 = arith.constant 1 : i32
      %c0_i32_14 = arith.constant 0 : i32
      %64 = tpu.memref_slice %arg8[%c1_i32_13, %c0_i32_14] : memref<16x128xf32, #tpu.memory_space<vmem>> -> memref<1x128xf32, #tpu.memory_space<vmem>>
      tpu.enqueue_dma source(%63 : memref<1x128xf32, #tpu.memory_space<any>>) target(%64 : memref<1x128xf32, #tpu.memory_space<vmem>>) target_semaphore(%arg9 : memref<!tpu.dma_semaphore, #tpu.memory_space<semaphore_mem>>)
      %c0_i32_15 = arith.constant 0 : i32
      %65 = tpu.memref_slice %arg3[%21, %c0_i32_15] : memref<2048x128xf32, #tpu.memory_space<any>> -> memref<1x128xf32, #tpu.memory_space<any>>
      %c2_i32_16 = arith.constant 2 : i32
      %c0_i32_17 = arith.constant 0 : i32
      %66 = tpu.memref_slice %arg8[%c2_i32_16, %c0_i32_17] : memref<16x128xf32, #tpu.memory_space<vmem>> -> memref<1x128xf32, #tpu.memory_space<vmem>>
      tpu.enqueue_dma source(%65 : memref<1x128xf32, #tpu.memory_space<any>>) target(%66 : memref<1x128xf32, #tpu.memory_space<vmem>>) target_semaphore(%arg9 : memref<!tpu.dma_semaphore, #tpu.memory_space<semaphore_mem>>)
      %c0_i32_18 = arith.constant 0 : i32
      %67 = tpu.memref_slice %arg3[%24, %c0_i32_18] : memref<2048x128xf32, #tpu.memory_space<any>> -> memref<1x128xf32, #tpu.memory_space<any>>
      %c3_i32_19 = arith.constant 3 : i32
      %c0_i32_20 = arith.constant 0 : i32
      %68 = tpu.memref_slice %arg8[%c3_i32_19, %c0_i32_20] : memref<16x128xf32, #tpu.memory_space<vmem>> -> memref<1x128xf32, #tpu.memory_space<vmem>>
      tpu.enqueue_dma source(%67 : memref<1x128xf32, #tpu.memory_space<any>>) target(%68 : memref<1x128xf32, #tpu.memory_space<vmem>>) target_semaphore(%arg9 : memref<!tpu.dma_semaphore, #tpu.memory_space<semaphore_mem>>)
      %c0_i32_21 = arith.constant 0 : i32
      %69 = tpu.memref_slice %arg3[%27, %c0_i32_21] : memref<2048x128xf32, #tpu.memory_space<any>> -> memref<1x128xf32, #tpu.memory_space<any>>
      %c4_i32_22 = arith.constant 4 : i32
      %c0_i32_23 = arith.constant 0 : i32
      %70 = tpu.memref_slice %arg8[%c4_i32_22, %c0_i32_23] : memref<16x128xf32, #tpu.memory_space<vmem>> -> memref<1x128xf32, #tpu.memory_space<vmem>>
      tpu.enqueue_dma source(%69 : memref<1x128xf32, #tpu.memory_space<any>>) target(%70 : memref<1x128xf32, #tpu.memory_space<vmem>>) target_semaphore(%arg9 : memref<!tpu.dma_semaphore, #tpu.memory_space<semaphore_mem>>)
      %c0_i32_24 = arith.constant 0 : i32
      %71 = tpu.memref_slice %arg3[%30, %c0_i32_24] : memref<2048x128xf32, #tpu.memory_space<any>> -> memref<1x128xf32, #tpu.memory_space<any>>
      %c5_i32_25 = arith.constant 5 : i32
      %c0_i32_26 = arith.constant 0 : i32
      %72 = tpu.memref_slice %arg8[%c5_i32_25, %c0_i32_26] : memref<16x128xf32, #tpu.memory_space<vmem>> -> memref<1x128xf32, #tpu.memory_space<vmem>>
      tpu.enqueue_dma source(%71 : memref<1x128xf32, #tpu.memory_space<any>>) target(%72 : memref<1x128xf32, #tpu.memory_space<vmem>>) target_semaphore(%arg9 : memref<!tpu.dma_semaphore, #tpu.memory_space<semaphore_mem>>)
      %c0_i32_27 = arith.constant 0 : i32
      %73 = tpu.memref_slice %arg3[%33, %c0_i32_27] : memref<2048x128xf32, #tpu.memory_space<any>> -> memref<1x128xf32, #tpu.memory_space<any>>
      %c6_i32_28 = arith.constant 6 : i32
      %c0_i32_29 = arith.constant 0 : i32
      %74 = tpu.memref_slice %arg8[%c6_i32_28, %c0_i32_29] : memref<16x128xf32, #tpu.memory_space<vmem>> -> memref<1x128xf32, #tpu.memory_space<vmem>>
      tpu.enqueue_dma source(%73 : memref<1x128xf32, #tpu.memory_space<any>>) target(%74 : memref<1x128xf32, #tpu.memory_space<vmem>>) target_semaphore(%arg9 : memref<!tpu.dma_semaphore, #tpu.memory_space<semaphore_mem>>)
      %c0_i32_30 = arith.constant 0 : i32
      %75 = tpu.memref_slice %arg3[%36, %c0_i32_30] : memref<2048x128xf32, #tpu.memory_space<any>> -> memref<1x128xf32, #tpu.memory_space<any>>
      %c7_i32_31 = arith.constant 7 : i32
      %c0_i32_32 = arith.constant 0 : i32
      %76 = tpu.memref_slice %arg8[%c7_i32_31, %c0_i32_32] : memref<16x128xf32, #tpu.memory_space<vmem>> -> memref<1x128xf32, #tpu.memory_space<vmem>>
      tpu.enqueue_dma source(%75 : memref<1x128xf32, #tpu.memory_space<any>>) target(%76 : memref<1x128xf32, #tpu.memory_space<vmem>>) target_semaphore(%arg9 : memref<!tpu.dma_semaphore, #tpu.memory_space<semaphore_mem>>)
      %c0_i32_33 = arith.constant 0 : i32
      %77 = tpu.memref_slice %arg3[%39, %c0_i32_33] : memref<2048x128xf32, #tpu.memory_space<any>> -> memref<1x128xf32, #tpu.memory_space<any>>
      %c8_i32_34 = arith.constant 8 : i32
      %c0_i32_35 = arith.constant 0 : i32
      %78 = tpu.memref_slice %arg8[%c8_i32_34, %c0_i32_35] : memref<16x128xf32, #tpu.memory_space<vmem>> -> memref<1x128xf32, #tpu.memory_space<vmem>>
      tpu.enqueue_dma source(%77 : memref<1x128xf32, #tpu.memory_space<any>>) target(%78 : memref<1x128xf32, #tpu.memory_space<vmem>>) target_semaphore(%arg9 : memref<!tpu.dma_semaphore, #tpu.memory_space<semaphore_mem>>)
      %c0_i32_36 = arith.constant 0 : i32
      %79 = tpu.memref_slice %arg3[%42, %c0_i32_36] : memref<2048x128xf32, #tpu.memory_space<any>> -> memref<1x128xf32, #tpu.memory_space<any>>
      %c9_i32_37 = arith.constant 9 : i32
      %c0_i32_38 = arith.constant 0 : i32
      %80 = tpu.memref_slice %arg8[%c9_i32_37, %c0_i32_38] : memref<16x128xf32, #tpu.memory_space<vmem>> -> memref<1x128xf32, #tpu.memory_space<vmem>>
      tpu.enqueue_dma source(%79 : memref<1x128xf32, #tpu.memory_space<any>>) target(%80 : memref<1x128xf32, #tpu.memory_space<vmem>>) target_semaphore(%arg9 : memref<!tpu.dma_semaphore, #tpu.memory_space<semaphore_mem>>)
      %c0_i32_39 = arith.constant 0 : i32
      %81 = tpu.memref_slice %arg3[%45, %c0_i32_39] : memref<2048x128xf32, #tpu.memory_space<any>> -> memref<1x128xf32, #tpu.memory_space<any>>
      %c10_i32_40 = arith.constant 10 : i32
      %c0_i32_41 = arith.constant 0 : i32
      %82 = tpu.memref_slice %arg8[%c10_i32_40, %c0_i32_41] : memref<16x128xf32, #tpu.memory_space<vmem>> -> memref<1x128xf32, #tpu.memory_space<vmem>>
      tpu.enqueue_dma source(%81 : memref<1x128xf32, #tpu.memory_space<any>>) target(%82 : memref<1x128xf32, #tpu.memory_space<vmem>>) target_semaphore(%arg9 : memref<!tpu.dma_semaphore, #tpu.memory_space<semaphore_mem>>)
      %c0_i32_42 = arith.constant 0 : i32
      %83 = tpu.memref_slice %arg3[%48, %c0_i32_42] : memref<2048x128xf32, #tpu.memory_space<any>> -> memref<1x128xf32, #tpu.memory_space<any>>
      %c11_i32_43 = arith.constant 11 : i32
      %c0_i32_44 = arith.constant 0 : i32
      %84 = tpu.memref_slice %arg8[%c11_i32_43, %c0_i32_44] : memref<16x128xf32, #tpu.memory_space<vmem>> -> memref<1x128xf32, #tpu.memory_space<vmem>>
      tpu.enqueue_dma source(%83 : memref<1x128xf32, #tpu.memory_space<any>>) target(%84 : memref<1x128xf32, #tpu.memory_space<vmem>>) target_semaphore(%arg9 : memref<!tpu.dma_semaphore, #tpu.memory_space<semaphore_mem>>)
      %c0_i32_45 = arith.constant 0 : i32
      %85 = tpu.memref_slice %arg3[%51, %c0_i32_45] : memref<2048x128xf32, #tpu.memory_space<any>> -> memref<1x128xf32, #tpu.memory_space<any>>
      %c12_i32_46 = arith.constant 12 : i32
      %c0_i32_47 = arith.constant 0 : i32
      %86 = tpu.memref_slice %arg8[%c12_i32_46, %c0_i32_47] : memref<16x128xf32, #tpu.memory_space<vmem>> -> memref<1x128xf32, #tpu.memory_space<vmem>>
      tpu.enqueue_dma source(%85 : memref<1x128xf32, #tpu.memory_space<any>>) target(%86 : memref<1x128xf32, #tpu.memory_space<vmem>>) target_semaphore(%arg9 : memref<!tpu.dma_semaphore, #tpu.memory_space<semaphore_mem>>)
      %c0_i32_48 = arith.constant 0 : i32
      %87 = tpu.memref_slice %arg3[%54, %c0_i32_48] : memref<2048x128xf32, #tpu.memory_space<any>> -> memref<1x128xf32, #tpu.memory_space<any>>
      %c13_i32_49 = arith.constant 13 : i32
      %c0_i32_50 = arith.constant 0 : i32
      %88 = tpu.memref_slice %arg8[%c13_i32_49, %c0_i32_50] : memref<16x128xf32, #tpu.memory_space<vmem>> -> memref<1x128xf32, #tpu.memory_space<vmem>>
      tpu.enqueue_dma source(%87 : memref<1x128xf32, #tpu.memory_space<any>>) target(%88 : memref<1x128xf32, #tpu.memory_space<vmem>>) target_semaphore(%arg9 : memref<!tpu.dma_semaphore, #tpu.memory_space<semaphore_mem>>)
      %c0_i32_51 = arith.constant 0 : i32
      %89 = tpu.memref_slice %arg3[%57, %c0_i32_51] : memref<2048x128xf32, #tpu.memory_space<any>> -> memref<1x128xf32, #tpu.memory_space<any>>
      %c14_i32_52 = arith.constant 14 : i32
      %c0_i32_53 = arith.constant 0 : i32
      %90 = tpu.memref_slice %arg8[%c14_i32_52, %c0_i32_53] : memref<16x128xf32, #tpu.memory_space<vmem>> -> memref<1x128xf32, #tpu.memory_space<vmem>>
      tpu.enqueue_dma source(%89 : memref<1x128xf32, #tpu.memory_space<any>>) target(%90 : memref<1x128xf32, #tpu.memory_space<vmem>>) target_semaphore(%arg9 : memref<!tpu.dma_semaphore, #tpu.memory_space<semaphore_mem>>)
      %c0_i32_54 = arith.constant 0 : i32
      %91 = tpu.memref_slice %arg3[%60, %c0_i32_54] : memref<2048x128xf32, #tpu.memory_space<any>> -> memref<1x128xf32, #tpu.memory_space<any>>
      %c15_i32_55 = arith.constant 15 : i32
      %c0_i32_56 = arith.constant 0 : i32
      %92 = tpu.memref_slice %arg8[%c15_i32_55, %c0_i32_56] : memref<16x128xf32, #tpu.memory_space<vmem>> -> memref<1x128xf32, #tpu.memory_space<vmem>>
      tpu.enqueue_dma source(%91 : memref<1x128xf32, #tpu.memory_space<any>>) target(%92 : memref<1x128xf32, #tpu.memory_space<vmem>>) target_semaphore(%arg9 : memref<!tpu.dma_semaphore, #tpu.memory_space<semaphore_mem>>)
      %c0_i32_57 = arith.constant 0 : i32
      %93 = tpu.memref_slice %arg3[%15, %c0_i32_57] : memref<2048x128xf32, #tpu.memory_space<any>> -> memref<1x128xf32, #tpu.memory_space<any>>
      %c0_i32_58 = arith.constant 0 : i32
      %c0_i32_59 = arith.constant 0 : i32
      %94 = tpu.memref_slice %arg8[%c0_i32_58, %c0_i32_59] : memref<16x128xf32, #tpu.memory_space<vmem>> -> memref<1x128xf32, #tpu.memory_space<vmem>>
      tpu.wait_dma2 semaphore(%arg9 : memref<!tpu.dma_semaphore, #tpu.memory_space<semaphore_mem>>) src(%93 : memref<1x128xf32, #tpu.memory_space<any>>) dst(%94 : memref<1x128xf32, #tpu.memory_space<vmem>>)
      %c0_i32_60 = arith.constant 0 : i32
      %95 = tpu.memref_slice %arg3[%18, %c0_i32_60] : memref<2048x128xf32, #tpu.memory_space<any>> -> memref<1x128xf32, #tpu.memory_space<any>>
      %c1_i32_61 = arith.constant 1 : i32
      %c0_i32_62 = arith.constant 0 : i32
      %96 = tpu.memref_slice %arg8[%c1_i32_61, %c0_i32_62] : memref<16x128xf32, #tpu.memory_space<vmem>> -> memref<1x128xf32, #tpu.memory_space<vmem>>
      tpu.wait_dma2 semaphore(%arg9 : memref<!tpu.dma_semaphore, #tpu.memory_space<semaphore_mem>>) src(%95 : memref<1x128xf32, #tpu.memory_space<any>>) dst(%96 : memref<1x128xf32, #tpu.memory_space<vmem>>)
      %c0_i32_63 = arith.constant 0 : i32
      %97 = tpu.memref_slice %arg3[%21, %c0_i32_63] : memref<2048x128xf32, #tpu.memory_space<any>> -> memref<1x128xf32, #tpu.memory_space<any>>
      %c2_i32_64 = arith.constant 2 : i32
      %c0_i32_65 = arith.constant 0 : i32
      %98 = tpu.memref_slice %arg8[%c2_i32_64, %c0_i32_65] : memref<16x128xf32, #tpu.memory_space<vmem>> -> memref<1x128xf32, #tpu.memory_space<vmem>>
      tpu.wait_dma2 semaphore(%arg9 : memref<!tpu.dma_semaphore, #tpu.memory_space<semaphore_mem>>) src(%97 : memref<1x128xf32, #tpu.memory_space<any>>) dst(%98 : memref<1x128xf32, #tpu.memory_space<vmem>>)
      %c0_i32_66 = arith.constant 0 : i32
      %99 = tpu.memref_slice %arg3[%24, %c0_i32_66] : memref<2048x128xf32, #tpu.memory_space<any>> -> memref<1x128xf32, #tpu.memory_space<any>>
      %c3_i32_67 = arith.constant 3 : i32
      %c0_i32_68 = arith.constant 0 : i32
      %100 = tpu.memref_slice %arg8[%c3_i32_67, %c0_i32_68] : memref<16x128xf32, #tpu.memory_space<vmem>> -> memref<1x128xf32, #tpu.memory_space<vmem>>
      tpu.wait_dma2 semaphore(%arg9 : memref<!tpu.dma_semaphore, #tpu.memory_space<semaphore_mem>>) src(%99 : memref<1x128xf32, #tpu.memory_space<any>>) dst(%100 : memref<1x128xf32, #tpu.memory_space<vmem>>)
      %c0_i32_69 = arith.constant 0 : i32
      %101 = tpu.memref_slice %arg3[%27, %c0_i32_69] : memref<2048x128xf32, #tpu.memory_space<any>> -> memref<1x128xf32, #tpu.memory_space<any>>
      %c4_i32_70 = arith.constant 4 : i32
      %c0_i32_71 = arith.constant 0 : i32
      %102 = tpu.memref_slice %arg8[%c4_i32_70, %c0_i32_71] : memref<16x128xf32, #tpu.memory_space<vmem>> -> memref<1x128xf32, #tpu.memory_space<vmem>>
      tpu.wait_dma2 semaphore(%arg9 : memref<!tpu.dma_semaphore, #tpu.memory_space<semaphore_mem>>) src(%101 : memref<1x128xf32, #tpu.memory_space<any>>) dst(%102 : memref<1x128xf32, #tpu.memory_space<vmem>>)
      %c0_i32_72 = arith.constant 0 : i32
      %103 = tpu.memref_slice %arg3[%30, %c0_i32_72] : memref<2048x128xf32, #tpu.memory_space<any>> -> memref<1x128xf32, #tpu.memory_space<any>>
      %c5_i32_73 = arith.constant 5 : i32
      %c0_i32_74 = arith.constant 0 : i32
      %104 = tpu.memref_slice %arg8[%c5_i32_73, %c0_i32_74] : memref<16x128xf32, #tpu.memory_space<vmem>> -> memref<1x128xf32, #tpu.memory_space<vmem>>
      tpu.wait_dma2 semaphore(%arg9 : memref<!tpu.dma_semaphore, #tpu.memory_space<semaphore_mem>>) src(%103 : memref<1x128xf32, #tpu.memory_space<any>>) dst(%104 : memref<1x128xf32, #tpu.memory_space<vmem>>)
      %c0_i32_75 = arith.constant 0 : i32
      %105 = tpu.memref_slice %arg3[%33, %c0_i32_75] : memref<2048x128xf32, #tpu.memory_space<any>> -> memref<1x128xf32, #tpu.memory_space<any>>
      %c6_i32_76 = arith.constant 6 : i32
      %c0_i32_77 = arith.constant 0 : i32
      %106 = tpu.memref_slice %arg8[%c6_i32_76, %c0_i32_77] : memref<16x128xf32, #tpu.memory_space<vmem>> -> memref<1x128xf32, #tpu.memory_space<vmem>>
      tpu.wait_dma2 semaphore(%arg9 : memref<!tpu.dma_semaphore, #tpu.memory_space<semaphore_mem>>) src(%105 : memref<1x128xf32, #tpu.memory_space<any>>) dst(%106 : memref<1x128xf32, #tpu.memory_space<vmem>>)
      %c0_i32_78 = arith.constant 0 : i32
      %107 = tpu.memref_slice %arg3[%36, %c0_i32_78] : memref<2048x128xf32, #tpu.memory_space<any>> -> memref<1x128xf32, #tpu.memory_space<any>>
      %c7_i32_79 = arith.constant 7 : i32
      %c0_i32_80 = arith.constant 0 : i32
      %108 = tpu.memref_slice %arg8[%c7_i32_79, %c0_i32_80] : memref<16x128xf32, #tpu.memory_space<vmem>> -> memref<1x128xf32, #tpu.memory_space<vmem>>
      tpu.wait_dma2 semaphore(%arg9 : memref<!tpu.dma_semaphore, #tpu.memory_space<semaphore_mem>>) src(%107 : memref<1x128xf32, #tpu.memory_space<any>>) dst(%108 : memref<1x128xf32, #tpu.memory_space<vmem>>)
      %c0_i32_81 = arith.constant 0 : i32
      %109 = tpu.memref_slice %arg3[%39, %c0_i32_81] : memref<2048x128xf32, #tpu.memory_space<any>> -> memref<1x128xf32, #tpu.memory_space<any>>
      %c8_i32_82 = arith.constant 8 : i32
      %c0_i32_83 = arith.constant 0 : i32
      %110 = tpu.memref_slice %arg8[%c8_i32_82, %c0_i32_83] : memref<16x128xf32, #tpu.memory_space<vmem>> -> memref<1x128xf32, #tpu.memory_space<vmem>>
      tpu.wait_dma2 semaphore(%arg9 : memref<!tpu.dma_semaphore, #tpu.memory_space<semaphore_mem>>) src(%109 : memref<1x128xf32, #tpu.memory_space<any>>) dst(%110 : memref<1x128xf32, #tpu.memory_space<vmem>>)
      %c0_i32_84 = arith.constant 0 : i32
      %111 = tpu.memref_slice %arg3[%42, %c0_i32_84] : memref<2048x128xf32, #tpu.memory_space<any>> -> memref<1x128xf32, #tpu.memory_space<any>>
      %c9_i32_85 = arith.constant 9 : i32
      %c0_i32_86 = arith.constant 0 : i32
      %112 = tpu.memref_slice %arg8[%c9_i32_85, %c0_i32_86] : memref<16x128xf32, #tpu.memory_space<vmem>> -> memref<1x128xf32, #tpu.memory_space<vmem>>
      tpu.wait_dma2 semaphore(%arg9 : memref<!tpu.dma_semaphore, #tpu.memory_space<semaphore_mem>>) src(%111 : memref<1x128xf32, #tpu.memory_space<any>>) dst(%112 : memref<1x128xf32, #tpu.memory_space<vmem>>)
      %c0_i32_87 = arith.constant 0 : i32
      %113 = tpu.memref_slice %arg3[%45, %c0_i32_87] : memref<2048x128xf32, #tpu.memory_space<any>> -> memref<1x128xf32, #tpu.memory_space<any>>
      %c10_i32_88 = arith.constant 10 : i32
      %c0_i32_89 = arith.constant 0 : i32
      %114 = tpu.memref_slice %arg8[%c10_i32_88, %c0_i32_89] : memref<16x128xf32, #tpu.memory_space<vmem>> -> memref<1x128xf32, #tpu.memory_space<vmem>>
      tpu.wait_dma2 semaphore(%arg9 : memref<!tpu.dma_semaphore, #tpu.memory_space<semaphore_mem>>) src(%113 : memref<1x128xf32, #tpu.memory_space<any>>) dst(%114 : memref<1x128xf32, #tpu.memory_space<vmem>>)
      %c0_i32_90 = arith.constant 0 : i32
      %115 = tpu.memref_slice %arg3[%48, %c0_i32_90] : memref<2048x128xf32, #tpu.memory_space<any>> -> memref<1x128xf32, #tpu.memory_space<any>>
      %c11_i32_91 = arith.constant 11 : i32
      %c0_i32_92 = arith.constant 0 : i32
      %116 = tpu.memref_slice %arg8[%c11_i32_91, %c0_i32_92] : memref<16x128xf32, #tpu.memory_space<vmem>> -> memref<1x128xf32, #tpu.memory_space<vmem>>
      tpu.wait_dma2 semaphore(%arg9 : memref<!tpu.dma_semaphore, #tpu.memory_space<semaphore_mem>>) src(%115 : memref<1x128xf32, #tpu.memory_space<any>>) dst(%116 : memref<1x128xf32, #tpu.memory_space<vmem>>)
      %c0_i32_93 = arith.constant 0 : i32
      %117 = tpu.memref_slice %arg3[%51, %c0_i32_93] : memref<2048x128xf32, #tpu.memory_space<any>> -> memref<1x128xf32, #tpu.memory_space<any>>
      %c12_i32_94 = arith.constant 12 : i32
      %c0_i32_95 = arith.constant 0 : i32
      %118 = tpu.memref_slice %arg8[%c12_i32_94, %c0_i32_95] : memref<16x128xf32, #tpu.memory_space<vmem>> -> memref<1x128xf32, #tpu.memory_space<vmem>>
      tpu.wait_dma2 semaphore(%arg9 : memref<!tpu.dma_semaphore, #tpu.memory_space<semaphore_mem>>) src(%117 : memref<1x128xf32, #tpu.memory_space<any>>) dst(%118 : memref<1x128xf32, #tpu.memory_space<vmem>>)
      %c0_i32_96 = arith.constant 0 : i32
      %119 = tpu.memref_slice %arg3[%54, %c0_i32_96] : memref<2048x128xf32, #tpu.memory_space<any>> -> memref<1x128xf32, #tpu.memory_space<any>>
      %c13_i32_97 = arith.constant 13 : i32
      %c0_i32_98 = arith.constant 0 : i32
      %120 = tpu.memref_slice %arg8[%c13_i32_97, %c0_i32_98] : memref<16x128xf32, #tpu.memory_space<vmem>> -> memref<1x128xf32, #tpu.memory_space<vmem>>
      tpu.wait_dma2 semaphore(%arg9 : memref<!tpu.dma_semaphore, #tpu.memory_space<semaphore_mem>>) src(%119 : memref<1x128xf32, #tpu.memory_space<any>>) dst(%120 : memref<1x128xf32, #tpu.memory_space<vmem>>)
      %c0_i32_99 = arith.constant 0 : i32
      %121 = tpu.memref_slice %arg3[%57, %c0_i32_99] : memref<2048x128xf32, #tpu.memory_space<any>> -> memref<1x128xf32, #tpu.memory_space<any>>
      %c14_i32_100 = arith.constant 14 : i32
      %c0_i32_101 = arith.constant 0 : i32
      %122 = tpu.memref_slice %arg8[%c14_i32_100, %c0_i32_101] : memref<16x128xf32, #tpu.memory_space<vmem>> -> memref<1x128xf32, #tpu.memory_space<vmem>>
      tpu.wait_dma2 semaphore(%arg9 : memref<!tpu.dma_semaphore, #tpu.memory_space<semaphore_mem>>) src(%121 : memref<1x128xf32, #tpu.memory_space<any>>) dst(%122 : memref<1x128xf32, #tpu.memory_space<vmem>>)
      %c0_i32_102 = arith.constant 0 : i32
      %123 = tpu.memref_slice %arg3[%60, %c0_i32_102] : memref<2048x128xf32, #tpu.memory_space<any>> -> memref<1x128xf32, #tpu.memory_space<any>>
      %c15_i32_103 = arith.constant 15 : i32
      %c0_i32_104 = arith.constant 0 : i32
      %124 = tpu.memref_slice %arg8[%c15_i32_103, %c0_i32_104] : memref<16x128xf32, #tpu.memory_space<vmem>> -> memref<1x128xf32, #tpu.memory_space<vmem>>
      tpu.wait_dma2 semaphore(%arg9 : memref<!tpu.dma_semaphore, #tpu.memory_space<semaphore_mem>>) src(%123 : memref<1x128xf32, #tpu.memory_space<any>>) dst(%124 : memref<1x128xf32, #tpu.memory_space<vmem>>)
      %c0_105 = arith.constant 0 : index
      %c0_106 = arith.constant 0 : index
      %125 = vector.load %arg8[%c0_105, %c0_106] : memref<16x128xf32, #tpu.memory_space<vmem>>, vector<16x128xf32>
      %126 = arith.mulf %125, %125 : vector<16x128xf32>
      %cst_107 = arith.constant dense<0.000000e+00> : vector<16xf32>
      %127 = vector.multi_reduction <add>, %126, %cst_107 [1] : vector<16x128xf32> to vector<16xf32>
      %128 = vector.shape_cast %127 : vector<16xf32> to vector<16x1xf32>
      %cst_108 = arith.constant 1.000000e+00 : f32
      %129 = vector.broadcast %cst_108 : f32 to vector<16x1xf32>
      %130 = arith.cmpf ogt, %128, %129 : vector<16x1xf32>
      %131 = math.rsqrt %128 : vector<16x1xf32>
      %cst_109 = arith.constant 1.000000e+00 : f32
      %132 = vector.broadcast %cst_109 : f32 to vector<16x1xf32>
      %133 = arith.mulf %132, %131 : vector<16x1xf32>
      %cst_110 = arith.constant 1.000000e+00 : f32
      %134 = vector.broadcast %cst_110 : f32 to vector<16x1xf32>
      %135 = arith.select %130, %133, %134 : vector<16x1xi1>, vector<16x1xf32>
      %136 = vector.broadcast %135 : vector<16x1xf32> to vector<16x128xf32>
      %137 = arith.mulf %125, %136 : vector<16x128xf32>
      %138 = arith.truncf %137 : vector<16x128xf32> to vector<16x128xbf16>
      %139 = arith.index_cast %arg1 : i32 to index
      %c0_111 = arith.constant 0 : index
      %c0_112 = arith.constant 0 : index
      %140 = vector.load %arg7[%139, %c0_111, %c0_112] : memref<1x16x128xbf16, #tpu.memory_space<vmem>>, vector<1x16x128xbf16>
      %141 = vector.shape_cast %140 : vector<1x16x128xbf16> to vector<16x128xbf16>
      %142 = vector.shape_cast %138 : vector<16x128xbf16> to vector<1x16x128xbf16>
      tpu.vector_store %arg7[%139, %c0_111, %c0_112], %142 {strides = array<i32>} : memref<1x16x128xbf16, #tpu.memory_space<vmem>>, vector<1x16x128xbf16>,
    } else {
    }
    %3 = arith.index_cast %arg1 : i32 to index
    %c0 = arith.constant 0 : index
    %c0_1 = arith.constant 0 : index
    %4 = vector.load %arg7[%3, %c0, %c0_1] : memref<1x16x128xbf16, #tpu.memory_space<vmem>>, vector<1x16x128xbf16>
    %5 = vector.shape_cast %4 : vector<1x16x128xbf16> to vector<16x128xbf16>
    %c0_2 = arith.constant 0 : index
    %c0_3 = arith.constant 0 : index
    %6 = vector.load %arg4[%c0_2, %c0_3] : memref<128x2048xbf16, #tpu.memory_space<vmem>>, vector<128x2048xbf16>
    %cst = arith.constant dense<0.000000e+00> : vector<16x2048xf32>
    %7 = tpu.matmul %5, %6, %cst {dimension_numbers = #tpu.dot_dimension_numbers<[1], [0], [0], [1], [0, 0, 1, 1], [], []>} : vector<16x128xbf16>, vector<128x2048xbf16>, vector<16x2048xf32> -> vector<16x2048xf32>
    %c0_4 = arith.constant 0 : index
    %c0_5 = arith.constant 0 : index
    %8 = vector.load %arg5[%c0_4, %c0_5] : memref<1x2048xf32, #tpu.memory_space<vmem>>, vector<1x2048xf32>
    %9 = vector.broadcast %8 : vector<1x2048xf32> to vector<16x2048xf32>
    %10 = arith.addf %7, %9 : vector<16x2048xf32>
    %c0_6 = arith.constant 0 : index
    %c0_7 = arith.constant 0 : index
    %11 = vector.load %arg6[%c0_6, %c0_7] : memref<16x2048xf32, #tpu.memory_space<vmem>>, vector<16x2048xf32>
    tpu.vector_store %arg6[%c0_6, %c0_7], %10 {strides = array<i32>} : memref<16x2048xf32, #tpu.memory_space<vmem>>, vector<16x2048xf32>,
    return
  }
  func.func @transform_1(%arg0: i32, %arg1: i32, %arg2: memref<16xi32, #tpu.memory_space<smem>>) -> (i32, i32) {
    %c0_i32 = arith.constant 0 : i32
    %c0_i32_0 = arith.constant 0 : i32
    return %c0_i32, %arg0 : i32, i32
  }
  func.func @transform_2(%arg0: i32, %arg1: i32, %arg2: memref<16xi32, #tpu.memory_space<smem>>) -> (i32, i32) {
    %c0_i32 = arith.constant 0 : i32
    %c0_i32_0 = arith.constant 0 : i32
    return %c0_i32, %arg0 : i32, i32
  }
  func.func @transform_3(%arg0: i32, %arg1: i32, %arg2: memref<16xi32, #tpu.memory_space<smem>>) -> (i32, i32) {
    %c0_i32 = arith.constant 0 : i32
    return %arg1, %arg0 : i32, i32
  }
}

</mosaic_0001>

<bundles_post_ra>
// kernel: tpu_custom_call.1
= control target key start
LH: loop header
LB: loop body
LE: loop exit
PB: predicated region body
PF: predicated region fallthrough
CT: control target
= control target key end

     0   :  { %s2291_s15 = smov [#allocation6]   ;;  %s2646_s0 = inlined_call_operand.hbm [shape: s32[16], index: 0, kind: input, shape index: {}]   ;;  %s2647_s1 = inlined_call_operand.hbm [shape: f32[2048,128], index: 1, kind: input, shape index: {}]   ;;  %s2648_s2 = inlined_call_operand.hbm [shape: bf16[128,2048], index: 2, kind: input, shape index: {}]   ;;  %s2649_s3 = inlined_call_operand.hbm [shape: f32[1,2048], index: 3, kind: input, shape index: {}]   ;;  %s2650_s4 = inlined_call_operand.hbm [shape: f32[16,2048], index: 4, kind: output, shape index: {}]  }
   0x1   :  { %10 = dma.hbm_to_smem %s2646_s0, 16, %s2291_s15, [#allocation5] }
   0x2   :  { %2281 = dma.done.wait [#allocation5], 16 }
   0x3   :  { %2282 = vsyncadd [#allocation5], 4294967280 }
   0x4   :  { %12 = sfence }
   0x5   :  { %13 = vsyncpa [#allocation8], 0 }
   0x6   :  { %14 = vsyncpa [#allocation11], 0 }
   0x7   :  { %15 = vsyncpa [#allocation9], 0  ;;  %s2292_s18 = smov [#allocation7]  }
   0x8   :  { %s21_s19 = sshll.u32 %s2292_s18, 4  ;;  %s22_s19 = int_to_ptr.vmem [resolvable:$true] %s21_s19 }
   0x9   :  { %s1877_s20 = scalar_lea.vmem %s22_s19, 16384  ;;  %p1882_p1 = scmp.lt.s32.totalorder %s22_s19, %s22_s19 }
   0xa   :  { %p1878_p0 = scmp.ne.s32.totalorder %s22_s19, %s1877_s20  ;;  %p1883_p2 = scmp.lt.s32.totalorder %s1877_s20, %s1877_s20 }
   0xc   :  { %p1884_p3 = por %p1883_p2, %p1882_p1 }
   0xe   :  { %p1885_p4 = pnand %p1884_p3, %p1878_p0 }
  0x10   :  { %1888 = shalt.err (!%p1885_p4)
}
  0x11   :  { %s2293_s21 = smov 1024   ;;  %s2294_s22 = smov 64  }
  0x12   :  { %27 = dma.hbm_to_vmem [thread:$0]  %s2648_s2, 16384, %s22_s19, [#allocation8], %s2293_s21, %s2293_s21, %s2294_s22  }
  0x13   :  { %s2295_s24 = smov [#allocation10]  }
  0x14   :  { %s34_s25 = sshll.u32 %s2295_s24, 4  ;;  %s35_s25 = int_to_ptr.vmem [resolvable:$true] %s34_s25 }
  0x15   :  { %s1897_s26 = scalar_lea.vmem %s35_s25, 256  ;;  %p1902_p6 = scmp.lt.s32.totalorder %s35_s25, %s35_s25 }
  0x16   :  { %p1898_p5 = scmp.ne.s32.totalorder %s35_s25, %s1897_s26  ;;  %p1903_p7 = scmp.lt.s32.totalorder %s1897_s26, %s1897_s26 }
  0x18   :  { %p1904_p8 = por %p1903_p7, %p1902_p6 }
  0x1a   :  { %p1905_p9 = pnand %p1904_p8, %p1898_p5 }
  0x1c   :  { %1908 = shalt.err (!%p1905_p9)
}
  0x1d   :  { %37 = dma.hbm_to_vmem [thread:$0]  %s2649_s3, 256, %s35_s25, [#allocation11]  }
  0x1e   :  { %2283 = dma.done.wait [#allocation8], 16384  }
  0x1f   :  { %2284 = vsyncadd [#allocation8], 4294950912 }
  0x20   :  { %2285 = dma.done.wait [#allocation11], 256  }
  0x21   :  { %2286 = vsyncadd [#allocation11], 4294967040  ;;  %s50_s29 = sld [smem:[#allocation6]]  ;;  %s2296_s2 = smov [#allocation3]  }
  0x22   :  { %s90_s30 = sshll.u32 %s2296_s2, 4  ;;  %s2352_s5 = sld [smem:[#allocation6 + $0x1]]  ;;  %s2350_s30 = int_to_ptr.vmem [resolvable:$true] %s90_s30 }
  0x23   :  { %s2297_s6 = smov [#allocation3 + $0x1]   ;;  %s2354_s8 = sld [smem:[#allocation6 + $0x2]] }
  0x24   :  { %s104_s7 = sshll.u32 %s2297_s6, 4  ;;  %s2298_s9 = smov [#allocation3 + $0x2]   ;;  %s2356_s7 = int_to_ptr.vmem [resolvable:$true] %s104_s7 }
  0x25   :  { %s118_s3 = sshll.u32 %s2298_s9, 4  ;;  %s2358_s10 = sld [smem:[#allocation6 + $0x3]]  ;;  %s2360_s3 = int_to_ptr.vmem [resolvable:$true] %s118_s3 }
  0x26   :  { %s2299_s12 = smov [#allocation3 + $0x3]   ;;  %s2371_s21 = scalar_lea.hbm %s2647_s1, 32768 }
  0x27   :  { %s1676_s11 = sshll.u32 %s50_s29, 4  ;;  %s2362_s13 = sshll.u32 %s2299_s12, 4  ;;  %s133_s13 = int_to_ptr.vmem [resolvable:$true] %s2362_s13 }
  0x28   :  { %s82_s16 = scalar_lea.hbm %s2647_s1, %s1676_s11  ;;  %s1677_s17 = sshll.u32 %s2352_s5, 4 }
  0x29   :  { %s1909_s18 = scalar_lea.hbm %s82_s16, 16  ;;  %p1912_p11 = scmp.lt.s32.totalorder %s82_s16, %s2647_s1 }
  0x2a   :  { %p1910_p10 = scmp.ne.s32.totalorder %s82_s16, %s1909_s18  ;;  %p1913_p12 = scmp.lt.s32.totalorder %s2371_s21, %s1909_s18 }
  0x2c   :  { %p1914_p13 = por %p1913_p12, %p1912_p11 }
  0x2e   :  { %p1915_p0 = pnand %p1914_p13, %p1910_p10 }
  0x30   :  { %1918 = shalt.err (!%p1915_p0)  }
  0x31   :  { %s1919_s0 = scalar_lea.vmem %s2350_s30, 16  ;;  %s2380_s24 = scalar_lea.vmem %s2350_s30, 256 }
  0x32   :  { %p1920_p1 = scmp.ne.s32.totalorder %s2350_s30, %s1919_s0  ;;  %p1924_p2 = scmp.lt.s32.totalorder %s2350_s30, %s2350_s30 }
  0x33   :  { %p1925_p3 = scmp.lt.s32.totalorder %s2380_s24, %s1919_s0 }
  0x35   :  { %p1926_p4 = por %p1925_p3, %p1924_p2 }
  0x37   :  { %p1927_p5 = pnand %p1926_p4, %p1920_p1 }
  0x39   :  { %1930 = shalt.err (!%p1927_p5)  }
  0x3a   :  { %93 = dma.hbm_to_vmem [thread:$0]  %s82_s16, 16, %s2350_s30, [#allocation4] }
  0x3b   :  { %s95_s27 = scalar_lea.hbm %s2647_s1, %s1677_s17  ;;  %s1678_s28 = sshll.u32 %s2354_s8, 4 }
  0x3c   :  { %s1931_s29 = scalar_lea.hbm %s95_s27, 16  ;;  %p1934_p7 = scmp.lt.s32.totalorder %s95_s27, %s2647_s1 }
  0x3d   :  { %p1932_p6 = scmp.ne.s32.totalorder %s95_s27, %s1931_s29  ;;  %p1935_p8 = scmp.lt.s32.totalorder %s2371_s21, %s1931_s29 }
  0x3f   :  { %p1936_p9 = por %p1935_p8, %p1934_p7 }
  0x41   :  { %p1937_p10 = pnand %p1936_p9, %p1932_p6 }
  0x43   :  { %1940 = shalt.err (!%p1937_p10)  }
  0x44   :  { %s1941_s6 = scalar_lea.vmem %s2356_s7, 16  ;;  %p1946_p12 = scmp.lt.s32.totalorder %s2356_s7, %s2350_s30 }
  0x45   :  { %p1942_p11 = scmp.ne.s32.totalorder %s2356_s7, %s1941_s6  ;;  %p1947_p13 = scmp.lt.s32.totalorder %s2380_s24, %s1941_s6 }
  0x47   :  { %p1948_p0 = por %p1947_p13, %p1946_p12 }
  0x49   :  { %p1949_p1 = pnand %p1948_p0, %p1942_p11 }
  0x4b   :  { %1952 = shalt.err (!%p1949_p1)  }
  0x4c   :  { %107 = dma.hbm_to_vmem [thread:$0]  %s95_s27, 16, %s2356_s7, [#allocation4] }
  0x4d   :  { %s109_s11 = scalar_lea.hbm %s2647_s1, %s1678_s28  ;;  %s1679_s12 = sshll.u32 %s2358_s10, 4 }
  0x4e   :  { %s1953_s14 = scalar_lea.hbm %s109_s11, 16  ;;  %p1956_p3 = scmp.lt.s32.totalorder %s109_s11, %s2647_s1 }
  0x4f   :  { %p1954_p2 = scmp.ne.s32.totalorder %s109_s11, %s1953_s14  ;;  %p1957_p4 = scmp.lt.s32.totalorder %s2371_s21, %s1953_s14 }
  0x51   :  { %p1958_p5 = por %p1957_p4, %p1956_p3 }
  0x53   :  { %p1959_p6 = pnand %p1958_p5, %p1954_p2 }
  0x55   :  { %1962 = shalt.err (!%p1959_p6)  }
  0x56   :  { %s1963_s7 = scalar_lea.vmem %s2360_s3, 16  ;;  %p1968_p8 = scmp.lt.s32.totalorder %s2360_s3, %s2350_s30 }
  0x57   :  { %p1964_p7 = scmp.ne.s32.totalorder %s2360_s3, %s1963_s7  ;;  %p1969_p9 = scmp.lt.s32.totalorder %s2380_s24, %s1963_s7 }
  0x59   :  { %p1970_p10 = por %p1969_p9, %p1968_p8 }
  0x5b   :  { %p1971_p11 = pnand %p1970_p10, %p1964_p7 }
  0x5d   :  { %1974 = shalt.err (!%p1971_p11)  }
  0x5e   :  { %121 = dma.hbm_to_vmem [thread:$0]  %s109_s11, 16, %s2360_s3, [#allocation4] }
  0x5f   :  { %s123_s18 = scalar_lea.hbm %s2647_s1, %s1679_s12 }
  0x60   :  { %s1975_s19 = scalar_lea.hbm %s123_s18, 16  ;;  %p1978_p13 = scmp.lt.s32.totalorder %s123_s18, %s2647_s1 }
  0x61   :  { %p1976_p12 = scmp.ne.s32.totalorder %s123_s18, %s1975_s19  ;;  %p1979_p0 = scmp.lt.s32.totalorder %s2371_s21, %s1975_s19 }
  0x63   :  { %p1980_p1 = por %p1979_p0, %p1978_p13 }
  0x65   :  { %p1981_p2 = pnand %p1980_p1, %p1976_p12 }
  0x67   :  { %1984 = shalt.err (!%p1981_p2)  }
  0x68   :  { %s1985_s23 = scalar_lea.vmem %s133_s13, 16  ;;  %p1990_p4 = scmp.lt.s32.totalorder %s133_s13, %s2350_s30 }
  0x69   :  { %p1986_p3 = scmp.ne.s32.totalorder %s133_s13, %s1985_s23  ;;  %p1991_p5 = scmp.lt.s32.totalorder %s2380_s24, %s1985_s23 }
  0x6b   :  { %p1992_p6 = por %p1991_p5, %p1990_p4 }
  0x6d   :  { %p1993_p7 = pnand %p1992_p6, %p1986_p3 }
  0x6f   :  { %1996 = shalt.err (!%p1993_p7)  }
  0x70   :  { %135 = dma.hbm_to_vmem [thread:$0]  %s123_s18, 16, %s133_s13, [#allocation4] }
  0x71   :  { %s1664_s3 = sld [smem:[#allocation6 + $0x4]]  ;;  %s2300_s0 = smov [#allocation3 + $0x4]  }
  0x72   :  { %s146_s25 = sshll.u32 %s2300_s0, 4  ;;  %s2424_s26 = sld [smem:[#allocation6 + $0x5]]  ;;  %s147_s25 = int_to_ptr.vmem [resolvable:$true] %s146_s25 }
  0x73   :  { %s2301_s27 = smov [#allocation3 + $0x5]   ;;  %s2426_s29 = sld [smem:[#allocation6 + $0x6]] }
  0x74   :  { %s160_s28 = sshll.u32 %s2301_s27, 4  ;;  %s2302_s2 = smov [#allocation3 + $0x6]   ;;  %s2428_s28 = int_to_ptr.vmem [resolvable:$true] %s160_s28 }
  0x75   :  { %s174_s5 = sshll.u32 %s2302_s2, 4  ;;  %s2430_s6 = sld [smem:[#allocation6 + $0x7]]  ;;  %s2432_s5 = int_to_ptr.vmem [resolvable:$true] %s174_s5 }
  0x77   :  { %s1680_s8 = sshll.u32 %s1664_s3, 4 }
  0x78   :  { %s137_s11 = scalar_lea.hbm %s2647_s1, %s1680_s8  ;;  %s1681_s12 = sshll.u32 %s2424_s26, 4 }
  0x79   :  { %s1997_s14 = scalar_lea.hbm %s137_s11, 16  ;;  %p2000_p9 = scmp.lt.s32.totalorder %s137_s11, %s2647_s1 }
  0x7a   :  { %p1998_p8 = scmp.ne.s32.totalorder %s137_s11, %s1997_s14  ;;  %p2001_p10 = scmp.lt.s32.totalorder %s2371_s21, %s1997_s14 }
  0x7c   :  { %p2002_p11 = por %p2001_p10, %p2000_p9 }
  0x7e   :  { %p2003_p12 = pnand %p2002_p11, %p1998_p8 }
  0x80   :  { %2006 = shalt.err (!%p2003_p12)  }
  0x81   :  { %s2007_s7 = scalar_lea.vmem %s147_s25, 16  ;;  %p2012_p0 = scmp.lt.s32.totalorder %s147_s25, %s2350_s30 }
  0x82   :  { %p2008_p13 = scmp.ne.s32.totalorder %s147_s25, %s2007_s7  ;;  %p2013_p1 = scmp.lt.s32.totalorder %s2380_s24, %s2007_s7 }
  0x84   :  { %p2014_p2 = por %p2013_p1, %p2012_p0 }
  0x86   :  { %p2015_p3 = pnand %p2014_p2, %p2008_p13 }
  0x88   :  { %2018 = shalt.err (!%p2015_p3)  }
  0x89   :  { %149 = dma.hbm_to_vmem [thread:$0]  %s137_s11, 16, %s147_s25, [#allocation4] }
  0x8a   :  { %s151_s18 = scalar_lea.hbm %s2647_s1, %s1681_s12  ;;  %s1682_s19 = sshll.u32 %s2426_s29, 4 }
  0x8b   :  { %s2019_s20 = scalar_lea.hbm %s151_s18, 16  ;;  %p2022_p5 = scmp.lt.s32.totalorder %s151_s18, %s2647_s1 }
  0x8c   :  { %p2020_p4 = scmp.ne.s32.totalorder %s151_s18, %s2019_s20  ;;  %p2023_p6 = scmp.lt.s32.totalorder %s2371_s21, %s2019_s20 }
  0x8e   :  { %p2024_p7 = por %p2023_p6, %p2022_p5 }
  0x90   :  { %p2025_p8 = pnand %p2024_p7, %p2020_p4 }
  0x92   :  { %2028 = shalt.err (!%p2025_p8)  }
  0x93   :  { %s2029_s3 = scalar_lea.vmem %s2428_s28, 16  ;;  %p2034_p10 = scmp.lt.s32.totalorder %s2428_s28, %s2350_s30 }
  0x94   :  { %p2030_p9 = scmp.ne.s32.totalorder %s2428_s28, %s2029_s3  ;;  %p2035_p11 = scmp.lt.s32.totalorder %s2380_s24, %s2029_s3 }
  0x96   :  { %p2036_p12 = por %p2035_p11, %p2034_p10 }
  0x98   :  { %p2037_p13 = pnand %p2036_p12, %p2030_p9 }
  0x9a   :  { %2040 = shalt.err (!%p2037_p13)  }
  0x9b   :  { %163 = dma.hbm_to_vmem [thread:$0]  %s151_s18, 16, %s2428_s28, [#allocation4] }
  0x9c   :  { %s165_s26 = scalar_lea.hbm %s2647_s1, %s1682_s19  ;;  %s1683_s27 = sshll.u32 %s2430_s6, 4 }
  0x9d   :  { %s2041_s29 = scalar_lea.hbm %s165_s26, 16  ;;  %p2044_p1 = scmp.lt.s32.totalorder %s165_s26, %s2647_s1 }
  0x9e   :  { %p2042_p0 = scmp.ne.s32.totalorder %s165_s26, %s2041_s29  ;;  %p2045_p2 = scmp.lt.s32.totalorder %s2371_s21, %s2041_s29 }
  0xa0   :  { %p2046_p3 = por %p2045_p2, %p2044_p1 }
  0xa2   :  { %p2047_p4 = pnand %p2046_p3, %p2042_p0 }
  0xa4   :  { %2050 = shalt.err (!%p2047_p4)  }
  0xa5   :  { %s2051_s28 = scalar_lea.vmem %s2432_s5, 16  ;;  %p2056_p6 = scmp.lt.s32.totalorder %s2432_s5, %s2350_s30 }
  0xa6   :  { %p2052_p5 = scmp.ne.s32.totalorder %s2432_s5, %s2051_s28  ;;  %p2057_p7 = scmp.lt.s32.totalorder %s2380_s24, %s2051_s28 }
  0xa8   :  { %p2058_p8 = por %p2057_p7, %p2056_p6 }
  0xaa   :  { %p2059_p9 = pnand %p2058_p8, %p2052_p5 }
  0xac   :  { %2062 = shalt.err (!%p2059_p9)  }
  0xad   :  { %177 = dma.hbm_to_vmem [thread:$0]  %s165_s26, 16, %s2432_s5, [#allocation4] }
  0xae   :  { %s179_s9 = scalar_lea.hbm %s2647_s1, %s1683_s27  ;;  %s2303_s11 = smov [#allocation3 + $0x7]  }
  0xaf   :  { %s188_s12 = sshll.u32 %s2303_s11, 4  ;;  %s1668_s14 = sld [smem:[#allocation6 + $0x8]]  ;;  %s189_s12 = int_to_ptr.vmem [resolvable:$true] %s188_s12 }
  0xb0   :  { %s2063_s15 = scalar_lea.hbm %s179_s9, 16  ;;  %p2066_p11 = scmp.lt.s32.totalorder %s179_s9, %s2647_s1 }
  0xb1   :  { %p2064_p10 = scmp.ne.s32.totalorder %s179_s9, %s2063_s15  ;;  %p2067_p12 = scmp.lt.s32.totalorder %s2371_s21, %s2063_s15 }
  0xb3   :  { %p2068_p13 = por %p2067_p12, %p2066_p11 }
  0xb5   :  { %p2069_p0 = pnand %p2068_p13, %p2064_p10 }
  0xb7   :  { %2072 = shalt.err (!%p2069_p0)  }
  0xb8   :  { %s2073_s10 = scalar_lea.vmem %s189_s12, 16  ;;  %p2078_p2 = scmp.lt.s32.totalorder %s189_s12, %s2350_s30 }
  0xb9   :  { %p2074_p1 = scmp.ne.s32.totalorder %s189_s12, %s2073_s10  ;;  %p2079_p3 = scmp.lt.s32.totalorder %s2380_s24, %s2073_s10 }
  0xbb   :  { %p2080_p4 = por %p2079_p3, %p2078_p2 }
  0xbd   :  { %p2081_p5 = pnand %p2080_p4, %p2074_p1 }
  0xbf   :  { %2084 = shalt.err (!%p2081_p5)  }
  0xc0   :  { %191 = dma.hbm_to_vmem [thread:$0]  %s179_s9, 16, %s189_s12, [#allocation4] }
  0xc1   :  { %s2304_s5 = smov [#allocation3 + $0x8]   ;;  %s1669_s18 = sld [smem:[#allocation6 + $0x9]] }
  0xc2   :  { %s202_s17 = sshll.u32 %s2304_s5, 4  ;;  %s2305_s19 = smov [#allocation3 + $0x9]   ;;  %s203_s17 = int_to_ptr.vmem [resolvable:$true] %s202_s17 }
  0xc3   :  { %s216_s20 = sshll.u32 %s2305_s19, 4  ;;  %s2481_s22 = sld [smem:[#allocation6 + $0xa]]  ;;  %s2483_s20 = int_to_ptr.vmem [resolvable:$true] %s216_s20 }
  0xc4   :  { %s1684_s23 = sshll.u32 %s1668_s14, 4 }
  0xc5   :  { %s193_s25 = scalar_lea.hbm %s2647_s1, %s1684_s23 }
  0xc6   :  { %s2085_s26 = scalar_lea.hbm %s193_s25, 16  ;;  %p2088_p7 = scmp.lt.s32.totalorder %s193_s25, %s2647_s1 }
  0xc7   :  { %p2086_p6 = scmp.ne.s32.totalorder %s193_s25, %s2085_s26  ;;  %p2089_p8 = scmp.lt.s32.totalorder %s2371_s21, %s2085_s26 }
  0xc9   :  { %p2090_p9 = por %p2089_p8, %p2088_p7 }
  0xcb   :  { %p2091_p10 = pnand %p2090_p9, %p2086_p6 }
  0xcd   :  { %2094 = shalt.err (!%p2091_p10)  }
  0xce   :  { %s2095_s2 = scalar_lea.vmem %s203_s17, 16  ;;  %p2100_p12 = scmp.lt.s32.totalorder %s203_s17, %s2350_s30 }
  0xcf   :  { %p2096_p11 = scmp.ne.s32.totalorder %s203_s17, %s2095_s2  ;;  %p2101_p13 = scmp.lt.s32.totalorder %s2380_s24, %s2095_s2 }
  0xd1   :  { %p2102_p0 = por %p2101_p13, %p2100_p12 }
  0xd3   :  { %p2103_p1 = pnand %p2102_p0, %p2096_p11 }
  0xd5   :  { %2106 = shalt.err (!%p2103_p1)  }
  0xd6   :  { %205 = dma.hbm_to_vmem [thread:$0]  %s193_s25, 16, %s203_s17, [#allocation4] }
  0xd7   :  { %s1685_s8 = sshll.u32 %s1669_s18, 4  ;;  %s2306_s28 = smov [#allocation3 + $0xa]  }
  0xd8   :  { %s230_s6 = sshll.u32 %s2306_s28, 4  ;;  %s207_s11 = scalar_lea.hbm %s2647_s1, %s1685_s8  ;;  %s2497_s6 = int_to_ptr.vmem [resolvable:$true] %s230_s6 }
  0xd9   :  { %s2107_s12 = scalar_lea.hbm %s207_s11, 16  ;;  %p2110_p3 = scmp.lt.s32.totalorder %s207_s11, %s2647_s1 }
  0xda   :  { %p2108_p2 = scmp.ne.s32.totalorder %s207_s11, %s2107_s12  ;;  %p2111_p4 = scmp.lt.s32.totalorder %s2371_s21, %s2107_s12 }
  0xdc   :  { %p2112_p5 = por %p2111_p4, %p2110_p3 }
  0xde   :  { %p2113_p6 = pnand %p2112_p5, %p2108_p2 }
  0xe0   :  { %2116 = shalt.err (!%p2113_p6)  }
  0xe1   :  { %s2117_s16 = scalar_lea.vmem %s2483_s20, 16  ;;  %p2122_p8 = scmp.lt.s32.totalorder %s2483_s20, %s2350_s30 }
  0xe2   :  { %p2118_p7 = scmp.ne.s32.totalorder %s2483_s20, %s2117_s16  ;;  %p2123_p9 = scmp.lt.s32.totalorder %s2380_s24, %s2117_s16 }
  0xe4   :  { %p2124_p10 = por %p2123_p9, %p2122_p8 }
  0xe6   :  { %p2125_p11 = pnand %p2124_p10, %p2118_p7 }
  0xe8   :  { %2128 = shalt.err (!%p2125_p11)  }
  0xe9   :  { %219 = dma.hbm_to_vmem [thread:$0]  %s207_s11, 16, %s2483_s20, [#allocation4] }
  0xea   :  { %s1686_s7 = sshll.u32 %s2481_s22, 4  ;;  %s1671_s10 = sld [smem:[#allocation6 + $0xb]] }
  0xeb   :  { %s221_s18 = scalar_lea.hbm %s2647_s1, %s1686_s7 }
  0xec   :  { %s2129_s19 = scalar_lea.hbm %s221_s18, 16  ;;  %p2132_p13 = scmp.lt.s32.totalorder %s221_s18, %s2647_s1 }
  0xed   :  { %p2130_p12 = scmp.ne.s32.totalorder %s221_s18, %s2129_s19  ;;  %p2133_p0 = scmp.lt.s32.totalorder %s2371_s21, %s2129_s19 }
  0xef   :  { %p2134_p1 = por %p2133_p0, %p2132_p13 }
  0xf1   :  { %p2135_p2 = pnand %p2134_p1, %p2130_p12 }
  0xf3   :  { %2138 = shalt.err (!%p2135_p2)  }
  0xf4   :  { %s2139_s20 = scalar_lea.vmem %s2497_s6, 16  ;;  %p2144_p4 = scmp.lt.s32.totalorder %s2497_s6, %s2350_s30 }
  0xf5   :  { %p2140_p3 = scmp.ne.s32.totalorder %s2497_s6, %s2139_s20  ;;  %p2145_p5 = scmp.lt.s32.totalorder %s2380_s24, %s2139_s20 }
  0xf7   :  { %p2146_p6 = por %p2145_p5, %p2144_p4 }
  0xf9   :  { %p2147_p7 = pnand %p2146_p6, %p2140_p3 }
  0xfb   :  { %2150 = shalt.err (!%p2147_p7)  }
  0xfc   :  { %233 = dma.hbm_to_vmem [thread:$0]  %s221_s18, 16, %s2497_s6, [#allocation4] }
  0xfd   :  { %s2307_s22 = smov [#allocation3 + $0xb]   ;;  %s1672_s25 = sld [smem:[#allocation6 + $0xc]] }
  0xfe   :  { %s244_s0 = sshll.u32 %s2307_s22, 4  ;;  %s2308_s26 = smov [#allocation3 + $0xc]   ;;  %s245_s0 = int_to_ptr.vmem [resolvable:$true] %s244_s0 }
  0xff   :  { %s258_s27 = sshll.u32 %s2308_s26, 4  ;;  %s2523_s29 = sld [smem:[#allocation6 + $0xd]]  ;;  %s2525_s27 = int_to_ptr.vmem [resolvable:$true] %s258_s27 }
 0x100   :  { %s1687_s2 = sshll.u32 %s1671_s10, 4 }
 0x101   :  { %s235_s13 = scalar_lea.hbm %s2647_s1, %s1687_s2 }
 0x102   :  { %s2151_s9 = scalar_lea.hbm %s235_s13, 16  ;;  %p2154_p9 = scmp.lt.s32.totalorder %s235_s13, %s2647_s1 }
 0x103   :  { %p2152_p8 = scmp.ne.s32.totalorder %s235_s13, %s2151_s9  ;;  %p2155_p10 = scmp.lt.s32.totalorder %s2371_s21, %s2151_s9 }
 0x105   :  { %p2156_p11 = por %p2155_p10, %p2154_p9 }
 0x107   :  { %p2157_p12 = pnand %p2156_p11, %p2152_p8 }
 0x109   :  { %2160 = shalt.err (!%p2157_p12)  }
 0x10a   :  { %s2161_s6 = scalar_lea.vmem %s245_s0, 16  ;;  %p2166_p0 = scmp.lt.s32.totalorder %s245_s0, %s2350_s30 }
 0x10b   :  { %p2162_p13 = scmp.ne.s32.totalorder %s245_s0, %s2161_s6  ;;  %p2167_p1 = scmp.lt.s32.totalorder %s2380_s24, %s2161_s6 }
 0x10d   :  { %p2168_p2 = por %p2167_p1, %p2166_p0 }
 0x10f   :  { %p2169_p3 = pnand %p2168_p2, %p2162_p13 }
 0x111   :  { %2172 = shalt.err (!%p2169_p3)  }
 0x112   :  { %247 = dma.hbm_to_vmem [thread:$0]  %s235_s13, 16, %s245_s0, [#allocation4] }
 0x113   :  { %s1688_s14 = sshll.u32 %s1672_s25, 4  ;;  %s2309_s15 = smov [#allocation3 + $0xd]  }
 0x114   :  { %s272_s16 = sshll.u32 %s2309_s15, 4  ;;  %s249_s5 = scalar_lea.hbm %s2647_s1, %s1688_s14  ;;  %s2539_s16 = int_to_ptr.vmem [resolvable:$true] %s272_s16 }
 0x115   :  { %s2173_s17 = scalar_lea.hbm %s249_s5, 16  ;;  %p2176_p5 = scmp.lt.s32.totalorder %s249_s5, %s2647_s1 }
 0x116   :  { %p2174_p4 = scmp.ne.s32.totalorder %s249_s5, %s2173_s17  ;;  %p2177_p6 = scmp.lt.s32.totalorder %s2371_s21, %s2173_s17 }
 0x118   :  { %p2178_p7 = por %p2177_p6, %p2176_p5 }
 0x11a   :  { %p2179_p8 = pnand %p2178_p7, %p2174_p4 }
 0x11c   :  { %2182 = shalt.err (!%p2179_p8)  }
 0x11d   :  { %s2183_s23 = scalar_lea.vmem %s2525_s27, 16  ;;  %p2188_p10 = scmp.lt.s32.totalorder %s2525_s27, %s2350_s30 }
 0x11e   :  { %p2184_p9 = scmp.ne.s32.totalorder %s2525_s27, %s2183_s23  ;;  %p2189_p11 = scmp.lt.s32.totalorder %s2380_s24, %s2183_s23 }
 0x120   :  { %p2190_p12 = por %p2189_p11, %p2188_p10 }
 0x122   :  { %p2191_p13 = pnand %p2190_p12, %p2184_p9 }
 0x124   :  { %2194 = shalt.err (!%p2191_p13)  }
 0x125   :  { %261 = dma.hbm_to_vmem [thread:$0]  %s249_s5, 16, %s2525_s27, [#allocation4] }
 0x126   :  { %s1689_s3 = sshll.u32 %s2523_s29, 4  ;;  %s1674_s20 = sld [smem:[#allocation6 + $0xe]] }
 0x127   :  { %s263_s25 = scalar_lea.hbm %s2647_s1, %s1689_s3 }
 0x128   :  { %s2195_s26 = scalar_lea.hbm %s263_s25, 16  ;;  %p2198_p1 = scmp.lt.s32.totalorder %s263_s25, %s2647_s1 }
 0x129   :  { %p2196_p0 = scmp.ne.s32.totalorder %s263_s25, %s2195_s26  ;;  %p2199_p2 = scmp.lt.s32.totalorder %s2371_s21, %s2195_s26 }
 0x12b   :  { %p2200_p3 = por %p2199_p2, %p2198_p1 }
 0x12d   :  { %p2201_p4 = pnand %p2200_p3, %p2196_p0 }
 0x12f   :  { %2204 = shalt.err (!%p2201_p4)  }
 0x130   :  { %s2205_s27 = scalar_lea.vmem %s2539_s16, 16  ;;  %p2210_p6 = scmp.lt.s32.totalorder %s2539_s16, %s2350_s30 }
 0x131   :  { %p2206_p5 = scmp.ne.s32.totalorder %s2539_s16, %s2205_s27  ;;  %p2211_p7 = scmp.lt.s32.totalorder %s2380_s24, %s2205_s27 }
 0x133   :  { %p2212_p8 = por %p2211_p7, %p2210_p6 }
 0x135   :  { %p2213_p9 = pnand %p2212_p8, %p2206_p5 }
 0x137   :  { %2216 = shalt.err (!%p2213_p9)  }
 0x138   :  { %275 = dma.hbm_to_vmem [thread:$0]  %s263_s25, 16, %s2539_s16, [#allocation4] }
 0x139   :  { %s2310_s29 = smov [#allocation3 + $0xe]   ;;  %s1675_s13 = sld [smem:[#allocation6 + $0xf]] }
 0x13a   :  { %s286_s28 = sshll.u32 %s2310_s29, 4  ;;  %s2311_s9 = smov [#allocation3 + $0xf]   ;;  %s287_s28 = int_to_ptr.vmem [resolvable:$true] %s286_s28 }
 0x13b   :  { %s300_s11 = sshll.u32 %s2311_s9, 4  ;;  %s1690_s12 = sshll.u32 %s1674_s20, 4  ;;  %s2568_s11 = int_to_ptr.vmem [resolvable:$true] %s300_s11 }
 0x13c   :  { %s277_s15 = scalar_lea.hbm %s2647_s1, %s1690_s12 }
 0x13d   :  { %s2217_s7 = scalar_lea.hbm %s277_s15, 16  ;;  %p2220_p11 = scmp.lt.s32.totalorder %s277_s15, %s2647_s1 }
 0x13e   :  { %p2218_p10 = scmp.ne.s32.totalorder %s277_s15, %s2217_s7  ;;  %p2221_p12 = scmp.lt.s32.totalorder %s2371_s21, %s2217_s7 }
 0x140   :  { %p2222_p13 = por %p2221_p12, %p2220_p11 }
 0x142   :  { %p2223_p0 = pnand %p2222_p13, %p2218_p10 }
 0x144   :  { %2226 = shalt.err (!%p2223_p0)  }
 0x145   :  { %s2227_s16 = scalar_lea.vmem %s287_s28, 16  ;;  %p2232_p2 = scmp.lt.s32.totalorder %s287_s28, %s2350_s30 }
 0x146   :  { %p2228_p1 = scmp.ne.s32.totalorder %s287_s28, %s2227_s16  ;;  %p2233_p3 = scmp.lt.s32.totalorder %s2380_s24, %s2227_s16 }
 0x148   :  { %p2234_p4 = por %p2233_p3, %p2232_p2 }
 0x14a   :  { %p2235_p5 = pnand %p2234_p4, %p2228_p1 }
 0x14c   :  { %2238 = shalt.err (!%p2235_p5)  }
 0x14d   :  { %289 = dma.hbm_to_vmem [thread:$0]  %s277_s15, 16, %s287_s28, [#allocation4] }
 0x14e   :  { %s1691_s17 = sshll.u32 %s1675_s13, 4 }
 0x14f   :  { %s291_s23 = scalar_lea.hbm %s2647_s1, %s1691_s17 }
 0x150   :  { %s2239_s3 = scalar_lea.hbm %s291_s23, 16  ;;  %p2242_p7 = scmp.lt.s32.totalorder %s291_s23, %s2647_s1 }
 0x151   :  { %p2240_p6 = scmp.ne.s32.totalorder %s291_s23, %s2239_s3  ;;  %p2243_p8 = scmp.lt.s32.totalorder %s2371_s21, %s2239_s3 }
 0x153   :  { %p2244_p9 = por %p2243_p8, %p2242_p7 }
 0x155   :  { %p2245_p10 = pnand %p2244_p9, %p2240_p6 }
 0x157   :  { %2248 = shalt.err (!%p2245_p10)  }
 0x158   :  { %s2249_s0 = scalar_lea.vmem %s2568_s11, 16  ;;  %p2254_p12 = scmp.lt.s32.totalorder %s2568_s11, %s2350_s30 }
 0x159   :  { %p2250_p11 = scmp.ne.s32.totalorder %s2568_s11, %s2249_s0  ;;  %p2255_p13 = scmp.lt.s32.totalorder %s2380_s24, %s2249_s0 }
 0x15b   :  { %p2256_p0 = por %p2255_p13, %p2254_p12 }
 0x15d   :  { %p2257_p1 = pnand %p2256_p0, %p2250_p11 }
 0x15f   :  { %2260 = shalt.err (!%p2257_p1)  }
 0x160   :  { %303 = dma.hbm_to_vmem [thread:$0]  %s291_s23, 16, %s2568_s11, [#allocation4] }
 0x161   :  { %2287 = dma.done.wait [#allocation4], 256 }
 0x162   :  { %2288 = vsyncadd [#allocation4], 4294967040  ;;  %v2589_v0 = vld [vmem:[#allocation3] sm:$0xff]  ;;  %v2591_v1 = vld [vmem:[#allocation3 + $0x8] sm:$0xff]  ;;  %s2313_s1 = smov [#allocation12]  }
 0x163   :  { %v339_v2 = vmul.f32 %v2589_v0, %v2589_v0  ;;  %v340_v3 = vmul.f32 %v2591_v1, %v2591_v1  ;;  %v483_v4 = vld [vmem:[#allocation7 + $0x380] sm:$0xff]  ;;  %v484_v6 = vld [vmem:[#allocation7 + $0x388] sm:$0xff]  ;;  %s1610_s30 = sshll.u32 %s2313_s1, 4  ;;  %s1611_s30 = int_to_ptr.vmem [resolvable:$true] %s1610_s30 }
 0x164   :  { %v491_v5 = vld [vmem:[#allocation7 + $0x3c0] sm:$0xff]  ;;  %v492_v8 = vld [vmem:[#allocation7 + $0x3c8] sm:$0xff]  ;;  %s2261_s21 = scalar_lea.vmem %s1611_s30, 4096  ;;  %p2266_p3 = scmp.lt.s32.totalorder %s1611_s30, %s1611_s30 }
 0x165   :  { %341 = vadd.xlane.f32.xlu0 %v339_v2  ;;  %v1808_v7 = vcombine.high %v483_v4, %v491_v5  ;;  %v1810_v9 = vcombine.high %v484_v6, %v492_v8  ;;  %v1807_v10 = vcombine.low %v483_v4, %v491_v5  ;;  %v1809_v11 = vcombine.low %v484_v6, %v492_v8  ;;  %v467_v12 = vld [vmem:[#allocation7 + $0x300] sm:$0xff]  ;;  %v468_v14 = vld [vmem:[#allocation7 + $0x308] sm:$0xff]  ;;  %v485_v4 = vld [vmem:[#allocation7 + $0x390] sm:$0xff]  ;;  %p2262_p2 = scmp.ne.s32.totalorder %s1611_s30, %s2261_s21  ;;  %p2267_p4 = scmp.lt.s32.totalorder %s2261_s21, %s2261_s21 }
 0x166   :  { %v475_v13 = vld [vmem:[#allocation7 + $0x340] sm:$0xff]  ;;  %v476_v16 = vld [vmem:[#allocation7 + $0x348] sm:$0xff]  ;;  %v493_v5 = vld [vmem:[#allocation7 + $0x3d0] sm:$0xff]  ;;  %v2312_v8 = vmov 0  }
 0x167   :  { %1229 = vmatprep.subr.bf16.mxu0 %v1808_v7  ;;  %1272 = vmatprep.subr.bf16.mxu1 %v1810_v9  ;;  %v1792_v15 = vcombine.high %v467_v12, %v475_v13  ;;  %v1794_v17 = vcombine.high %v468_v14, %v476_v16  ;;  %v1791_v18 = vcombine.low %v467_v12, %v475_v13  ;;  %v451_v20 = vld [vmem:[#allocation7 + $0x280] sm:$0xff]  ;;  %v452_v22 = vld [vmem:[#allocation7 + $0x288] sm:$0xff]  ;;  %p2268_p5 = por %p2267_p4, %p2266_p3 }
 0x168   :  { %1230 = vmatpush1.bf16.msra.mxu0 %v1807_v10  ;;  %1273 = vmatpush1.bf16.msra.mxu1 %v1809_v11  ;;  %v1793_v19 = vcombine.low %v468_v14, %v476_v16  ;;  %v459_v21 = vld [vmem:[#allocation7 + $0x2c0] sm:$0xff]  ;;  %v460_v24 = vld [vmem:[#allocation7 + $0x2c8] sm:$0xff]  ;;  %v1811_v9 = vcombine.low %v485_v4, %v493_v5  ;;  %v486_v10 = vld [vmem:[#allocation7 + $0x398] sm:$0xff]  ;;  %v1812_v12 = vcombine.high %v485_v4, %v493_v5 }
 0x169   :  { %343 = vadd.xlane.f32.xlu0 %v340_v3  ;;  %1231 = vmatprep.subr.bf16.mxu0 %v1792_v15  ;;  %v1776_v23 = vcombine.high %v451_v20, %v459_v21  ;;  %v1778_v25 = vcombine.high %v452_v22, %v460_v24  ;;  %v1775_v26 = vcombine.low %v451_v20, %v459_v21  ;;  %v435_v28 = vld [vmem:[#allocation7 + $0x200] sm:$0xff]  ;;  %v436_v30 = vld [vmem:[#allocation7 + $0x208] sm:$0xff]  ;;  %v494_v11 = vld [vmem:[#allocation7 + $0x3d8] sm:$0xff]  ;;  %p2269_p6 = pnand %p2268_p5, %p2262_p2 }
 0x16a   :  { %1274 = vmatprep.subr.bf16.mxu1 %v1794_v17  ;;  %v1777_v27 = vcombine.low %v452_v22, %v460_v24  ;;  %v443_v29 = vld [vmem:[#allocation7 + $0x240] sm:$0xff]  ;;  %v444_v32 = vld [vmem:[#allocation7 + $0x248] sm:$0xff]  ;;  %1261 = vmatprep.mubr.bf16.mxu0 %v2312_v8  ;;  %v1813_v13 = vcombine.low %v486_v10, %v494_v11  ;;  %v1814_v14 = vcombine.high %v486_v10, %v494_v11  ;;  %v469_v24 = vld [vmem:[#allocation7 + $0x310] sm:$0xff] }
 0x16b   :  { %v1760_v31 = vcombine.high %v435_v28, %v443_v29  ;;  %v1762_v33 = vcombine.high %v436_v30, %v444_v32  ;;  %v1759_v34 = vcombine.low %v435_v28, %v443_v29  ;;  %v1761_v35 = vcombine.low %v436_v30, %v444_v32  ;;  %v419_v36 = vld [vmem:[#allocation7 + $0x180] sm:$0xff]  ;;  %v420_v38 = vld [vmem:[#allocation7 + $0x188] sm:$0xff]  ;;  %1304 = vmatprep.mubr.bf16.mxu1 %v2312_v8  ;;  %v453_v28 = vld [vmem:[#allocation7 + $0x290] sm:$0xff] }
 0x16c   :  { %1232 = vmatpush1.bf16.msra.mxu0 %v1791_v18  ;;  %1275 = vmatpush1.bf16.msra.mxu1 %v1793_v19  ;;  %v427_v37 = vld [vmem:[#allocation7 + $0x1c0] sm:$0xff]  ;;  %v428_v40 = vld [vmem:[#allocation7 + $0x1c8] sm:$0xff]  ;;  %v461_v32 = vld [vmem:[#allocation7 + $0x2d0] sm:$0xff] }
 0x16d   :  { %1233 = vmatprep.subr.bf16.mxu0 %v1776_v23  ;;  %1276 = vmatprep.subr.bf16.mxu1 %v1778_v25  ;;  %v1744_v39 = vcombine.high %v419_v36, %v427_v37  ;;  %v1746_v41 = vcombine.high %v420_v38, %v428_v40  ;;  %v1743_v42 = vcombine.low %v419_v36, %v427_v37  ;;  %v403_v44 = vld [vmem:[#allocation7 + $0x100] sm:$0xff]  ;;  %v404_v46 = vld [vmem:[#allocation7 + $0x108] sm:$0xff]  ;;  %v477_v25 = vld [vmem:[#allocation7 + $0x350] sm:$0xff] }
 0x16e   :  { %v1745_v43 = vcombine.low %v420_v38, %v428_v40  ;;  %v411_v45 = vld [vmem:[#allocation7 + $0x140] sm:$0xff]  ;;  %v412_v48 = vld [vmem:[#allocation7 + $0x148] sm:$0xff]  ;;  %v1796_v30 = vcombine.high %v469_v24, %v477_v25  ;;  %v437_v37 = vld [vmem:[#allocation7 + $0x210] sm:$0xff] }
 0x16f   :  { %v1728_v47 = vcombine.high %v403_v44, %v411_v45  ;;  %v1730_v49 = vcombine.high %v404_v46, %v412_v48  ;;  %v1727_v50 = vcombine.low %v403_v44, %v411_v45  ;;  %v1729_v51 = vcombine.low %v404_v46, %v412_v48  ;;  %v387_v52 = vld [vmem:[#allocation7 + $0x80] sm:$0xff]  ;;  %v388_v54 = vld [vmem:[#allocation7 + $0x88] sm:$0xff]  ;;  %v445_v38 = vld [vmem:[#allocation7 + $0x250] sm:$0xff] }
 0x170   :  { %1234 = vmatpush1.bf16.msra.mxu0 %v1775_v26  ;;  %1277 = vmatpush1.bf16.msra.mxu1 %v1777_v27  ;;  %v395_v53 = vld [vmem:[#allocation7 + $0xc0] sm:$0xff]  ;;  %v396_v56 = vld [vmem:[#allocation7 + $0xc8] sm:$0xff]  ;;  %v470_v26 = vld [vmem:[#allocation7 + $0x318] sm:$0xff] }
 0x171   :  { %1235 = vmatprep.subr.bf16.mxu0 %v1760_v31  ;;  %1278 = vmatprep.subr.bf16.mxu1 %v1762_v33  ;;  %v1712_v55 = vcombine.high %v387_v52, %v395_v53  ;;  %v1714_v57 = vcombine.high %v388_v54, %v396_v56  ;;  %v1711_v58 = vcombine.low %v387_v52, %v395_v53  ;;  %v371_v60 = vld [vmem:[#allocation7] sm:$0xff]  ;;  %v372_v62 = vld [vmem:[#allocation7 + $0x8] sm:$0xff]  ;;  %v478_v27 = vld [vmem:[#allocation7 + $0x358] sm:$0xff] }
 0x172   :  { %v1713_v59 = vcombine.low %v388_v54, %v396_v56  ;;  %v379_v61 = vld [vmem:[#allocation7 + $0x40] sm:$0xff]  ;;  %v380_v2 = vld [vmem:[#allocation7 + $0x48] sm:$0xff]  ;;  %v1798_v31 = vcombine.high %v470_v26, %v478_v27  ;;  %v454_v33 = vld [vmem:[#allocation7 + $0x298] sm:$0xff] }
 0x173   :  { %v1696_v63 = vcombine.high %v371_v60, %v379_v61  ;;  %v1695_v3 = vcombine.low %v371_v60, %v379_v61  ;;  %v1698_v6 = vcombine.high %v372_v62, %v380_v2  ;;  %v1697_v7 = vcombine.low %v372_v62, %v380_v2  ;;  %v446_v40 = vld [vmem:[#allocation7 + $0x258] sm:$0xff]  ;;  %v421_v45 = vld [vmem:[#allocation7 + $0x190] sm:$0xff] }
 0x174   :  { %1236 = vmatpush1.bf16.msra.mxu0 %v1759_v34  ;;  %1279 = vmatpush1.bf16.msra.mxu1 %v1761_v35  ;;  %v462_v34 = vld [vmem:[#allocation7 + $0x2d8] sm:$0xff]  ;;  %v1780_v35 = vcombine.high %v453_v28, %v461_v32  ;;  %v429_v46 = vld [vmem:[#allocation7 + $0x1d0] sm:$0xff] }
 0x175   :  { %1237 = vmatprep.subr.bf16.mxu0 %v1744_v39  ;;  %1280 = vmatprep.subr.bf16.mxu1 %v1746_v41  ;;  %v1782_v36 = vcombine.high %v454_v33, %v462_v34  ;;  %v438_v39 = vld [vmem:[#allocation7 + $0x218] sm:$0xff]  ;;  %v1779_v41 = vcombine.low %v453_v28, %v461_v32  ;;  %v405_v53 = vld [vmem:[#allocation7 + $0x110] sm:$0xff] }
 0x176   :  { %v1766_v44 = vcombine.high %v438_v39, %v446_v40  ;;  %v430_v48 = vld [vmem:[#allocation7 + $0x1d8] sm:$0xff]  ;;  %v413_v54 = vld [vmem:[#allocation7 + $0x150] sm:$0xff] }
 0x177   :  { %v414_v56 = vld [vmem:[#allocation7 + $0x158] sm:$0xff]  ;;  %v389_v61 = vld [vmem:[#allocation7 + $0x90] sm:$0xff] }
 0x178   :  { %1238 = vmatpush1.bf16.msra.mxu0 %v1743_v42  ;;  %1281 = vmatpush1.bf16.msra.mxu1 %v1745_v43  ;;  %v1781_v42 = vcombine.low %v454_v33, %v462_v34  ;;  %v1764_v43 = vcombine.high %v437_v37, %v445_v38  ;;  %v397_v62 = vld [vmem:[#allocation7 + $0xd0] sm:$0xff]  ;;  %v398_v2 = vld [vmem:[#allocation7 + $0xd8] sm:$0xff]  ;;  %v455_v33 = vld [vmem:[#allocation7 + $0x2a0] sm:$0xff] }
 0x179   :  { %1239 = vmatprep.subr.bf16.mxu0 %v1728_v47  ;;  %1282 = vmatprep.subr.bf16.mxu1 %v1730_v49  ;;  %v422_v47 = vld [vmem:[#allocation7 + $0x198] sm:$0xff]  ;;  %v1763_v49 = vcombine.low %v437_v37, %v445_v38  ;;  %v1716_v5 = vcombine.high %v389_v61, %v397_v62  ;;  %v463_v34 = vld [vmem:[#allocation7 + $0x2e0] sm:$0xff] }
 0x17a   :  { %v1750_v52 = vcombine.high %v422_v47, %v430_v48  ;;  %v374_v10 = vld [vmem:[#allocation7 + $0x18] sm:$0xff]  ;;  %v1784_v37 = vcombine.high %v455_v33, %v463_v34 }
 0x17b   :  { %v382_v11 = vld [vmem:[#allocation7 + $0x58] sm:$0xff] }
 0x17c   :  { %1240 = vmatpush1.bf16.msra.mxu0 %v1727_v50  ;;  %1283 = vmatpush1.bf16.msra.mxu1 %v1729_v51  ;;  %v1765_v50 = vcombine.low %v438_v39, %v446_v40  ;;  %v1748_v51 = vcombine.high %v421_v45, %v429_v46  ;;  %v439_v39 = vld [vmem:[#allocation7 + $0x220] sm:$0xff] }
 0x17d   :  { %1241 = vmatprep.subr.bf16.mxu0 %v1712_v55  ;;  %1284 = vmatprep.subr.bf16.mxu1 %v1714_v57  ;;  %v406_v55 = vld [vmem:[#allocation7 + $0x118] sm:$0xff]  ;;  %v1747_v57 = vcombine.low %v421_v45, %v429_v46  ;;  %v447_v40 = vld [vmem:[#allocation7 + $0x260] sm:$0xff] }
 0x17e   :  { %v1734_v60 = vcombine.high %v406_v55, %v414_v56  ;;  %v1733_v4 = vcombine.low %v406_v55, %v414_v56  ;;  %v1768_v45 = vcombine.high %v439_v39, %v447_v40  ;;  %v407_v55 = vld [vmem:[#allocation7 + $0x120] sm:$0xff] }
 0x17f   :  { %v415_v56 = vld [vmem:[#allocation7 + $0x160] sm:$0xff] }
 0x180   :  { %1242 = vmatpush1.bf16.msra.mxu0 %v1711_v58  ;;  %1285 = vmatpush1.bf16.msra.mxu1 %v1713_v59  ;;  %v1749_v58 = vcombine.low %v422_v47, %v430_v48  ;;  %v1732_v59 = vcombine.high %v405_v53, %v413_v54  ;;  %v423_v47 = vld [vmem:[#allocation7 + $0x1a0] sm:$0xff] }
 0x181   :  { %1243 = vmatprep.subr.bf16.mxu0 %v1696_v63  ;;  %1286 = vmatprep.subr.bf16.mxu1 %v1698_v6  ;;  %v390_v63 = vld [vmem:[#allocation7 + $0x98] sm:$0xff]  ;;  %v431_v48 = vld [vmem:[#allocation7 + $0x1e0] sm:$0xff] }
 0x182   :  { %v1718_v6 = vcombine.high %v390_v63, %v398_v2 }
 0x184   :  { %1244 = vmatpush1.bf16.msra.mxu0 %v1695_v3  ;;  %1287 = vmatpush1.bf16.msra.mxu1 %v1697_v7  ;;  %v1731_v3 = vcombine.low %v405_v53, %v413_v54  ;;  %v373_v7 = vld [vmem:[#allocation7 + $0x10] sm:$0xff]  ;;  %v1752_v53 = vcombine.high %v423_v47, %v431_v48 }
 0x185   :  { %1315 = vmatprep.subr.bf16.mxu0 %v1812_v12  ;;  %1358 = vmatprep.subr.bf16.mxu1 %v1814_v14  ;;  %v1715_v12 = vcombine.low %v389_v61, %v397_v62  ;;  %v1736_v61 = vcombine.high %v407_v55, %v415_v56 }
 0x1ee   :  { %v342_v15 = vpop.xlane.xlu0 %341 }
 0x1ef   :  { %1857 = vrsqrt.f32 %v342_v15  ;;  %vm345_vm0 = vcmp.gt.f32.partialorder %v342_v15, 1.0  ;;  %v1702_v15 = vcombine.high %v374_v10, %v382_v11 }
 0x1f2   :  { %v344_v16 = vpop.xlane.xlu0 %343 }
 0x1f3   :  { %1859 = vrsqrt.f32 %v344_v16  ;;  %vm346_vm1 = vcmp.gt.f32.partialorder %v344_v16, 1.0  ;;  %v487_v16 = vld [vmem:[#allocation7 + $0x3a0] sm:$0xff] }
 0x1fc   :  { %v1858_v17 = vpop.eup %1857 }
 0x1fd   :  { %v349_v18 = vsel %vm345_vm0, %v1858_v17, 1.0  ;;  %v495_v17 = vld [vmem:[#allocation7 + $0x3e0] sm:$0xff] }
 0x1fe   :  { %v351_v21 = vmul.f32 %v349_v18, %v2589_v0  ;;  %v1795_v0 = vcombine.low %v469_v24, %v477_v25  ;;  %v488_v18 = vld [vmem:[#allocation7 + $0x3a8] sm:$0xff]  ;;  %v471_v24 = vld [vmem:[#allocation7 + $0x320] sm:$0xff]  ;;  %v1815_v28 = vcombine.low %v487_v16, %v495_v17 }
 0x1ff   :  { %v479_v25 = vld [vmem:[#allocation7 + $0x360] sm:$0xff] }
 0x200   :  { %v1860_v19 = vpop.eup %1859 }
 0x201   :  { %v350_v20 = vsel %vm346_vm1, %v1860_v19, 1.0  ;;  %v496_v19 = vld [vmem:[#allocation7 + $0x3e8] sm:$0xff] }
 0x202   :  { %v352_v22 = vmul.f32 %v350_v20, %v2591_v1  ;;  %v1797_v1 = vcombine.low %v470_v26, %v478_v27  ;;  %v472_v26 = vld [vmem:[#allocation7 + $0x328] sm:$0xff] }
 0x203   :  { %v480_v27 = vld [vmem:[#allocation7 + $0x368] sm:$0xff] }
 0x204   :  { %v1829_v23 = vpack.c.bf16 %v352_v22, %v351_v21  ;;  %v1701_v21 = vcombine.low %v374_v10, %v382_v11  ;;  %v1816_v22 = vcombine.high %v487_v16, %v495_v17  ;;  %v1802_v32 = vcombine.high %v472_v26, %v480_v27  ;;  %v375_v10 = vld [vmem:[#allocation7 + $0x20] sm:$0xff] }
 0x205   :  { %v383_v11 = vld [vmem:[#allocation7 + $0x60] sm:$0xff] }
 0x206   :  { %1830 = vst [vmem:[#allocation2] sm:$0xff] %v1829_v23   ;;  %v1818_v23 = vcombine.high %v488_v18, %v496_v19  ;;  %v1704_v16 = vcombine.high %v375_v10, %v383_v11 }
 0x20d   :  { %v2601_v29 = vld [vmem:[#allocation2] sm:$0xff]  }
 0x20e   :  { %1262 = vmatmul.mubr.bf16.vlgmr.msra.gmra.mxu0 %v2601_v29  ;;  %1305 = vmatmul.mubr.bf16.vlgmr.msra.gmra.mxu1 %v2601_v29 }
 0x20f   :  { %1316 = vmatpush1.bf16.msra.mxu0 %v1811_v9  ;;  %1359 = vmatpush1.bf16.msra.mxu1 %v1813_v13  ;;  %v381_v9 = vld [vmem:[#allocation7 + $0x50] sm:$0xff]  ;;  %v1717_v13 = vcombine.low %v390_v63, %v398_v2  ;;  %v391_v63 = vld [vmem:[#allocation7 + $0xa0] sm:$0xff] }
 0x210   :  { %1317 = vmatprep.subr.bf16.mxu0 %v1796_v30  ;;  %1360 = vmatprep.subr.bf16.mxu1 %v1798_v31  ;;  %v1700_v14 = vcombine.high %v373_v7, %v381_v9  ;;  %v1699_v20 = vcombine.low %v373_v7, %v381_v9  ;;  %v1817_v30 = vcombine.low %v488_v18, %v496_v19  ;;  %v399_v2 = vld [vmem:[#allocation7 + $0xe0] sm:$0xff]  ;;  %v489_v18 = vld [vmem:[#allocation7 + $0x3b0] sm:$0xff] }
 0x211   :  { %1347 = vmatprep.mubr.bf16.mxu0 %v2312_v8  ;;  %1390 = vmatprep.mubr.bf16.mxu1 %v2312_v8  ;;  %v1800_v31 = vcombine.high %v471_v24, %v479_v25  ;;  %v1720_v7 = vcombine.high %v391_v63, %v399_v2  ;;  %v497_v19 = vld [vmem:[#allocation7 + $0x3f0] sm:$0xff] }
 0x213   :  { %1318 = vmatpush1.bf16.msra.mxu0 %v1795_v0  ;;  %1361 = vmatpush1.bf16.msra.mxu1 %v1797_v1  ;;  %v456_v0 = vld [vmem:[#allocation7 + $0x2a8] sm:$0xff] }
 0x214   :  { %1319 = vmatprep.subr.bf16.mxu0 %v1780_v35  ;;  %1362 = vmatprep.subr.bf16.mxu1 %v1782_v36  ;;  %v464_v1 = vld [vmem:[#allocation7 + $0x2e8] sm:$0xff]  ;;  %v1799_v35 = vcombine.low %v471_v24, %v479_v25  ;;  %v1801_v36 = vcombine.low %v472_v26, %v480_v27  ;;  %v1820_v24 = vcombine.high %v489_v18, %v497_v19  ;;  %v473_v26 = vld [vmem:[#allocation7 + $0x330] sm:$0xff] }
 0x215   :  { %v1786_v38 = vcombine.high %v456_v0, %v464_v1  ;;  %v481_v27 = vld [vmem:[#allocation7 + $0x370] sm:$0xff] }
 0x217   :  { %1320 = vmatpush1.bf16.msra.mxu0 %v1779_v41  ;;  %1363 = vmatpush1.bf16.msra.mxu1 %v1781_v42  ;;  %v440_v41 = vld [vmem:[#allocation7 + $0x228] sm:$0xff] }
 0x218   :  { %1321 = vmatprep.subr.bf16.mxu0 %v1764_v43  ;;  %1364 = vmatprep.subr.bf16.mxu1 %v1766_v44  ;;  %v448_v42 = vld [vmem:[#allocation7 + $0x268] sm:$0xff]  ;;  %v1783_v43 = vcombine.low %v455_v33, %v463_v34  ;;  %v1785_v44 = vcombine.low %v456_v0, %v464_v1  ;;  %v1804_v33 = vcombine.high %v473_v26, %v481_v27  ;;  %v457_v0 = vld [vmem:[#allocation7 + $0x2b0] sm:$0xff] }
 0x219   :  { %v1770_v46 = vcombine.high %v440_v41, %v448_v42  ;;  %v465_v1 = vld [vmem:[#allocation7 + $0x2f0] sm:$0xff] }
 0x21b   :  { %1322 = vmatpush1.bf16.msra.mxu0 %v1763_v49  ;;  %1365 = vmatpush1.bf16.msra.mxu1 %v1765_v50  ;;  %v424_v49 = vld [vmem:[#allocation7 + $0x1a8] sm:$0xff] }
 0x21c   :  { %1323 = vmatprep.subr.bf16.mxu0 %v1748_v51  ;;  %1366 = vmatprep.subr.bf16.mxu1 %v1750_v52  ;;  %v432_v50 = vld [vmem:[#allocation7 + $0x1e8] sm:$0xff]  ;;  %v1767_v51 = vcombine.low %v439_v39, %v447_v40  ;;  %v1769_v52 = vcombine.low %v440_v41, %v448_v42  ;;  %v1788_v39 = vcombine.high %v457_v0, %v465_v1  ;;  %v441_v41 = vld [vmem:[#allocation7 + $0x230] sm:$0xff] }
 0x21d   :  { %v1754_v54 = vcombine.high %v424_v49, %v432_v50  ;;  %v449_v42 = vld [vmem:[#allocation7 + $0x270] sm:$0xff] }
 0x21f   :  { %1324 = vmatpush1.bf16.msra.mxu0 %v1747_v57  ;;  %1367 = vmatpush1.bf16.msra.mxu1 %v1749_v58  ;;  %v408_v57 = vld [vmem:[#allocation7 + $0x128] sm:$0xff] }
 0x220   :  { %1325 = vmatprep.subr.bf16.mxu0 %v1732_v59  ;;  %1368 = vmatprep.subr.bf16.mxu1 %v1734_v60  ;;  %v416_v58 = vld [vmem:[#allocation7 + $0x168] sm:$0xff]  ;;  %v1751_v59 = vcombine.low %v423_v47, %v431_v48  ;;  %v1753_v60 = vcombine.low %v424_v49, %v432_v50  ;;  %v1772_v47 = vcombine.high %v441_v41, %v449_v42  ;;  %v425_v49 = vld [vmem:[#allocation7 + $0x1b0] sm:$0xff] }
 0x221   :  { %v1738_v62 = vcombine.high %v408_v57, %v416_v58  ;;  %v433_v50 = vld [vmem:[#allocation7 + $0x1f0] sm:$0xff] }
 0x223   :  { %1326 = vmatpush1.bf16.msra.mxu0 %v1731_v3  ;;  %1369 = vmatpush1.bf16.msra.mxu1 %v1733_v4  ;;  %v392_v3 = vld [vmem:[#allocation7 + $0xa8] sm:$0xff] }
 0x224   :  { %1327 = vmatprep.subr.bf16.mxu0 %v1716_v5  ;;  %1370 = vmatprep.subr.bf16.mxu1 %v1718_v6  ;;  %v400_v4 = vld [vmem:[#allocation7 + $0xe8] sm:$0xff]  ;;  %v1735_v5 = vcombine.low %v407_v55, %v415_v56  ;;  %v1737_v6 = vcombine.low %v408_v57, %v416_v58  ;;  %v1756_v55 = vcombine.high %v425_v49, %v433_v50  ;;  %v409_v56 = vld [vmem:[#allocation7 + $0x130] sm:$0xff]  ;;  %v410_v58 = vld [vmem:[#allocation7 + $0x138] sm:$0xff] }
 0x225   :  { %v1722_v9 = vcombine.high %v392_v3, %v400_v4  ;;  %v417_v57 = vld [vmem:[#allocation7 + $0x170] sm:$0xff] }
 0x227   :  { %1328 = vmatpush1.bf16.msra.mxu0 %v1715_v12  ;;  %1371 = vmatpush1.bf16.msra.mxu1 %v1717_v13  ;;  %v376_v12 = vld [vmem:[#allocation7 + $0x28] sm:$0xff] }
 0x228   :  { %1329 = vmatprep.subr.bf16.mxu0 %v1700_v14  ;;  %1372 = vmatprep.subr.bf16.mxu1 %v1702_v15  ;;  %v384_v13 = vld [vmem:[#allocation7 + $0x68] sm:$0xff]  ;;  %v1719_v14 = vcombine.low %v391_v63, %v399_v2  ;;  %v1721_v15 = vcombine.low %v392_v3, %v400_v4  ;;  %v393_v2 = vld [vmem:[#allocation7 + $0xb0] sm:$0xff]  ;;  %v394_v4 = vld [vmem:[#allocation7 + $0xb8] sm:$0xff] }
 0x229   :  { %v1706_v17 = vcombine.high %v376_v12, %v384_v13  ;;  %v401_v3 = vld [vmem:[#allocation7 + $0xf0] sm:$0xff] }
 0x22b   :  { %1330 = vmatpush1.bf16.msra.mxu0 %v1699_v20  ;;  %1373 = vmatpush1.bf16.msra.mxu1 %v1701_v21  ;;  %v490_v20 = vld [vmem:[#allocation7 + $0x3b8] sm:$0xff] }
 0x22c   :  { %1401 = vmatprep.subr.bf16.mxu0 %v1816_v22  ;;  %1444 = vmatprep.subr.bf16.mxu1 %v1818_v23  ;;  %v498_v21 = vld [vmem:[#allocation7 + $0x3f8] sm:$0xff]  ;;  %v1703_v22 = vcombine.low %v375_v10, %v383_v11  ;;  %v1705_v23 = vcombine.low %v376_v12, %v384_v13  ;;  %v377_v11 = vld [vmem:[#allocation7 + $0x30] sm:$0xff] }
 0x22d   :  { %v1822_v25 = vcombine.high %v490_v20, %v498_v21  ;;  %v385_v12 = vld [vmem:[#allocation7 + $0x70] sm:$0xff]  ;;  %v378_v13 = vld [vmem:[#allocation7 + $0x38] sm:$0xff] }
 0x22e   :  { %1348 = vmatmul.mubr.bf16.vlgmr.msra.gmra.mxu0 %v2601_v29  ;;  %1391 = vmatmul.mubr.bf16.vlgmr.msra.gmra.mxu1 %v2601_v29 }
 0x22f   :  { %1402 = vmatpush1.bf16.msra.mxu0 %v1815_v28  ;;  %1445 = vmatpush1.bf16.msra.mxu1 %v1817_v30  ;;  %v474_v28 = vld [vmem:[#allocation7 + $0x338] sm:$0xff] }
 0x230   :  { %1403 = vmatprep.subr.bf16.mxu0 %v1800_v31  ;;  %1446 = vmatprep.subr.bf16.mxu1 %v1802_v32  ;;  %v482_v30 = vld [vmem:[#allocation7 + $0x378] sm:$0xff]  ;;  %v1819_v31 = vcombine.low %v489_v18, %v497_v19  ;;  %v1821_v32 = vcombine.low %v490_v20, %v498_v21  ;;  %v1707_v19 = vcombine.low %v377_v11, %v385_v12  ;;  %v503_v21 = vlaneseq }
 0x231   :  { %1433 = vmatprep.mubr.bf16.mxu0 %v2312_v8  ;;  %1476 = vmatprep.mubr.bf16.mxu1 %v2312_v8  ;;  %v1806_v34 = vcombine.high %v474_v28, %v482_v30 }
 0x233   :  { %1404 = vmatpush1.bf16.msra.mxu0 %v1799_v35  ;;  %1447 = vmatpush1.bf16.msra.mxu1 %v1801_v36  ;;  %v458_v35 = vld [vmem:[#allocation7 + $0x2b8] sm:$0xff] }
 0x234   :  { %1405 = vmatprep.subr.bf16.mxu0 %v1784_v37  ;;  %1448 = vmatprep.subr.bf16.mxu1 %v1786_v38  ;;  %v466_v36 = vld [vmem:[#allocation7 + $0x2f8] sm:$0xff]  ;;  %v1803_v37 = vcombine.low %v473_v26, %v481_v27  ;;  %v1805_v38 = vcombine.low %v474_v28, %v482_v30 }
 0x235   :  { %v1790_v40 = vcombine.high %v458_v35, %v466_v36 }
 0x237   :  { %1406 = vmatpush1.bf16.msra.mxu0 %v1783_v43  ;;  %1449 = vmatpush1.bf16.msra.mxu1 %v1785_v44  ;;  %v442_v43 = vld [vmem:[#allocation7 + $0x238] sm:$0xff] }
 0x238   :  { %1407 = vmatprep.subr.bf16.mxu0 %v1768_v45  ;;  %1450 = vmatprep.subr.bf16.mxu1 %v1770_v46  ;;  %v450_v44 = vld [vmem:[#allocation7 + $0x278] sm:$0xff]  ;;  %v1787_v45 = vcombine.low %v457_v0, %v465_v1  ;;  %v1789_v46 = vcombine.low %v458_v35, %v466_v36 }
 0x239   :  { %v1774_v48 = vcombine.high %v442_v43, %v450_v44 }
 0x23b   :  { %1408 = vmatpush1.bf16.msra.mxu0 %v1767_v51  ;;  %1451 = vmatpush1.bf16.msra.mxu1 %v1769_v52  ;;  %v426_v51 = vld [vmem:[#allocation7 + $0x1b8] sm:$0xff] }
 0x23c   :  { %1409 = vmatprep.subr.bf16.mxu0 %v1752_v53  ;;  %1452 = vmatprep.subr.bf16.mxu1 %v1754_v54  ;;  %v434_v52 = vld [vmem:[#allocation7 + $0x1f8] sm:$0xff]  ;;  %v1771_v53 = vcombine.low %v441_v41, %v449_v42  ;;  %v1773_v54 = vcombine.low %v442_v43, %v450_v44 }
 0x23f   :  { %1410 = vmatpush1.bf16.msra.mxu0 %v1751_v59  ;;  %1453 = vmatpush1.bf16.msra.mxu1 %v1753_v60  ;;  %v418_v59 = vld [vmem:[#allocation7 + $0x178] sm:$0xff]  ;;  %v1755_v60 = vcombine.low %v425_v49, %v433_v50 }
 0x240   :  { %1411 = vmatprep.subr.bf16.mxu0 %v1736_v61  ;;  %1454 = vmatprep.subr.bf16.mxu1 %v1738_v62  ;;  %v1757_v61 = vcombine.low %v426_v51, %v434_v52  ;;  %v1740_v62 = vcombine.high %v409_v56, %v417_v57  ;;  %v1742_v63 = vcombine.high %v410_v58, %v418_v59 }
 0x243   :  { %1412 = vmatpush1.bf16.msra.mxu0 %v1735_v5  ;;  %1455 = vmatpush1.bf16.msra.mxu1 %v1737_v6  ;;  %v402_v5 = vld [vmem:[#allocation7 + $0xf8] sm:$0xff]  ;;  %v1739_v6 = vcombine.low %v409_v56, %v417_v57 }
 0x244   :  { %1413 = vmatprep.subr.bf16.mxu0 %v1720_v7  ;;  %1456 = vmatprep.subr.bf16.mxu1 %v1722_v9  ;;  %v1741_v7 = vcombine.low %v410_v58, %v418_v59  ;;  %v1724_v9 = vcombine.high %v393_v2, %v401_v3  ;;  %v1726_v10 = vcombine.high %v394_v4, %v402_v5 }
 0x247   :  { %1414 = vmatpush1.bf16.msra.mxu0 %v1719_v14  ;;  %1457 = vmatpush1.bf16.msra.mxu1 %v1721_v15  ;;  %v386_v14 = vld [vmem:[#allocation7 + $0x78] sm:$0xff]  ;;  %v1723_v15 = vcombine.low %v393_v2, %v401_v3 }
 0x248   :  { %1415 = vmatprep.subr.bf16.mxu0 %v1704_v16  ;;  %1458 = vmatprep.subr.bf16.mxu1 %v1706_v17  ;;  %v1725_v16 = vcombine.low %v394_v4, %v402_v5  ;;  %v1708_v17 = vcombine.high %v377_v11, %v385_v12  ;;  %v1710_v18 = vcombine.high %v378_v13, %v386_v14 }
 0x249   :  { %v1709_v20 = vcombine.low %v378_v13, %v386_v14 }
 0x24b   :  { %1416 = vmatpush1.bf16.msra.mxu0 %v1703_v22  ;;  %1459 = vmatpush1.bf16.msra.mxu1 %v1705_v23  ;;  %v2617_v22 = vshrl.u32 %v503_v21, 7 }
 0x24c   :  { %1487 = vmatprep.subr.bf16.mxu0 %v1820_v24  ;;  %1530 = vmatprep.subr.bf16.mxu1 %v1822_v25  ;;  %v499_v25 = vld [vmem:[#allocation10] sm:$0xff] }
 0x24d   :  { %v505_v23 = vsub.s32 0, %v2617_v22  ;;  %v513_v24 = vsub.s32 2, %v2617_v22  ;;  %v509_v26 = vsub.s32 1, %v2617_v22  ;;  %v517_v27 = vsub.s32 3, %v2617_v22 }
 0x24e   :  { %1434 = vmatmul.mubr.bf16.vlgmr.msra.gmra.mxu0 %v2601_v29  ;;  %1477 = vmatmul.mubr.bf16.vlgmr.msra.gmra.mxu1 %v2601_v29  ;;  %v533_v49 = vsub.s32 7, %v2617_v22 }
 0x24f   :  { %1488 = vmatpush1.bf16.msra.mxu0 %v1819_v31  ;;  %1531 = vmatpush1.bf16.msra.mxu1 %v1821_v32  ;;  %v506_v28 = vrot.slane %v499_v25, %v505_v23  ;;  %v514_v30 = vrot.slane %v499_v25, %v513_v24  ;;  %v518_v31 = vrot.slane %v499_v25, %v517_v27 }
 0x250   :  { %1489 = vmatprep.subr.bf16.mxu0 %v1804_v33  ;;  %1532 = vmatprep.subr.bf16.mxu1 %v1806_v34 }
 0x251   :  { %1519 = vmatprep.mubr.bf16.mxu0 %v2312_v8  ;;  %1562 = vmatprep.mubr.bf16.mxu1 %v2312_v8  ;;  %v1758_v8 = vcombine.high %v426_v51, %v434_v52 }
 0x253   :  { %1490 = vmatpush1.bf16.msra.mxu0 %v1803_v37  ;;  %1533 = vmatpush1.bf16.msra.mxu1 %v1805_v38 }
 0x254   :  { %1491 = vmatprep.subr.bf16.mxu0 %v1788_v39  ;;  %1534 = vmatprep.subr.bf16.mxu1 %v1790_v40 }
 0x257   :  { %1492 = vmatpush1.bf16.msra.mxu0 %v1787_v45  ;;  %1535 = vmatpush1.bf16.msra.mxu1 %v1789_v46  ;;  %v521_v46 = vsub.s32 4, %v2617_v22 }
 0x258   :  { %1493 = vmatprep.subr.bf16.mxu0 %v1772_v47  ;;  %1536 = vmatprep.subr.bf16.mxu1 %v1774_v48  ;;  %v529_v47 = vsub.s32 6, %v2617_v22  ;;  %v525_v48 = vsub.s32 5, %v2617_v22 }
 0x259   :  { %v522_v50 = vrot.slane %v499_v25, %v521_v46 }
 0x25a   :  { %v530_v51 = vrot.slane %v499_v25, %v529_v47  ;;  %v526_v52 = vrot.slane %v499_v25, %v525_v48 }
 0x25b   :  { %1494 = vmatpush1.bf16.msra.mxu0 %v1771_v53  ;;  %1537 = vmatpush1.bf16.msra.mxu1 %v1773_v54  ;;  %v534_v53 = vrot.slane %v499_v25, %v533_v49 }
 0x25c   :  { %1495 = vmatprep.subr.bf16.mxu0 %v1756_v55  ;;  %1538 = vmatprep.subr.bf16.mxu1 %v1758_v8 }
 0x25f   :  { %1496 = vmatpush1.bf16.msra.mxu0 %v1755_v60  ;;  %1539 = vmatpush1.bf16.msra.mxu1 %v1757_v61 }
 0x260   :  { %1497 = vmatprep.subr.bf16.mxu0 %v1740_v62  ;;  %1540 = vmatprep.subr.bf16.mxu1 %v1742_v63 }
 0x263   :  { %1498 = vmatpush1.bf16.msra.mxu0 %v1739_v6  ;;  %1541 = vmatpush1.bf16.msra.mxu1 %v1741_v7  ;;  %v500_v7 = vld [vmem:[#allocation10 + $0x8] sm:$0xff] }
 0x264   :  { %1499 = vmatprep.subr.bf16.mxu0 %v1724_v9  ;;  %1542 = vmatprep.subr.bf16.mxu1 %v1726_v10  ;;  %v538_v9 = vrot.slane %v500_v7, %v505_v23  ;;  %v546_v10 = vrot.slane %v500_v7, %v513_v24  ;;  %v542_v11 = vrot.slane %v500_v7, %v509_v26 }
 0x265   :  { %v550_v12 = vrot.slane %v500_v7, %v517_v27 }
 0x267   :  { %1500 = vmatpush1.bf16.msra.mxu0 %v1723_v15  ;;  %1543 = vmatpush1.bf16.msra.mxu1 %v1725_v16 }
 0x268   :  { %1501 = vmatprep.subr.bf16.mxu0 %v1708_v17  ;;  %1544 = vmatprep.subr.bf16.mxu1 %v1710_v18 }
 0x26b   :  { %1502 = vmatpush1.bf16.msra.mxu0 %v1707_v19  ;;  %1545 = vmatpush1.bf16.msra.mxu1 %v1709_v20 }
 0x26e   :  { %1520 = vmatmul.mubr.bf16.vlgmr.msra.gmra.mxu0 %v2601_v29  ;;  %1563 = vmatmul.mubr.bf16.vlgmr.msra.gmra.mxu1 %v2601_v29  ;;  %v510_v29 = vrot.slane %v499_v25, %v509_v26 }
 0x2ce   :  { %v1263_v32 = vpop.f32.mrf.mxu0  ;;  %v1306_v33 = vpop.f32.mrf.mxu1 }
 0x2cf   :  { %v1264_v34 = vadd.f32 %v1263_v32, %v506_v28  ;;  %v1307_v0 = vadd.f32 %v1306_v33, %v514_v30  ;;  %v566_v32 = vrot.slane %v500_v7, %v533_v49 }
 0x2d0   :  { %v1265_v1 = vpop.f32.mrf.mxu0  ;;  %v1308_v35 = vpop.f32.mrf.mxu1 }
 0x2d1   :  { %1573 = vst [vmem:[#allocation12] sm:$0xff] %v1264_v34  ;;  %1575 = vst [vmem:[#allocation12 + $0x10] sm:$0xff] %v1307_v0  ;;  %v1266_v36 = vadd.f32 %v1265_v1, %v510_v29  ;;  %v1309_v37 = vadd.f32 %v1308_v35, %v518_v31 }
 0x2d2   :  { %v1267_v38 = vpop.f32.mrf.mxu0  ;;  %v1310_v39 = vpop.f32.mrf.mxu1 }
 0x2d3   :  { %1574 = vst [vmem:[#allocation12 + $0x8] sm:$0xff] %v1266_v36  ;;  %1576 = vst [vmem:[#allocation12 + $0x18] sm:$0xff] %v1309_v37  ;;  %v1268_v40 = vadd.f32 %v1267_v38, %v506_v28  ;;  %v1311_v41 = vadd.f32 %v1310_v39, %v514_v30  ;;  %v554_v30 = vrot.slane %v500_v7, %v521_v46 }
 0x2d4   :  { %v1269_v42 = vpop.f32.mrf.mxu0  ;;  %v1312_v43 = vpop.f32.mrf.mxu1 }
 0x2d5   :  { %1589 = vst [vmem:[#allocation12 + $0x80] sm:$0xff] %v1268_v40  ;;  %1591 = vst [vmem:[#allocation12 + $0x90] sm:$0xff] %v1311_v41  ;;  %v1270_v44 = vadd.f32 %v1269_v42, %v510_v29  ;;  %v1313_v45 = vadd.f32 %v1312_v43, %v518_v31  ;;  %v562_v29 = vrot.slane %v500_v7, %v529_v47 }
 0x2d6   :  { %v558_v31 = vrot.slane %v500_v7, %v525_v48 }
 0x2d7   :  { %1590 = vst [vmem:[#allocation12 + $0x88] sm:$0xff] %v1270_v44  ;;  %1592 = vst [vmem:[#allocation12 + $0x98] sm:$0xff] %v1313_v45 }
 0x2ee   :  { %v1349_v54 = vpop.f32.mrf.mxu0  ;;  %v1392_v55 = vpop.f32.mrf.mxu1 }
 0x2ef   :  { %v1350_v8 = vadd.f32 %v1349_v54, %v522_v50  ;;  %v1393_v56 = vadd.f32 %v1392_v55, %v530_v51 }
 0x2f0   :  { %v1351_v57 = vpop.f32.mrf.mxu0  ;;  %v1394_v58 = vpop.f32.mrf.mxu1 }
 0x2f1   :  { %1577 = vst [vmem:[#allocation12 + $0x20] sm:$0xff] %v1350_v8  ;;  %1579 = vst [vmem:[#allocation12 + $0x30] sm:$0xff] %v1393_v56  ;;  %v1352_v59 = vadd.f32 %v1351_v57, %v526_v52  ;;  %v1395_v60 = vadd.f32 %v1394_v58, %v534_v53 }
 0x2f2   :  { %v1353_v61 = vpop.f32.mrf.mxu0  ;;  %v1396_v62 = vpop.f32.mrf.mxu1 }
 0x2f3   :  { %1578 = vst [vmem:[#allocation12 + $0x28] sm:$0xff] %v1352_v59  ;;  %1580 = vst [vmem:[#allocation12 + $0x38] sm:$0xff] %v1395_v60  ;;  %v1354_v63 = vadd.f32 %v1353_v61, %v522_v50  ;;  %v1397_v2 = vadd.f32 %v1396_v62, %v530_v51 }
 0x2f4   :  { %v1355_v3 = vpop.f32.mrf.mxu0  ;;  %v1398_v4 = vpop.f32.mrf.mxu1 }
 0x2f5   :  { %1593 = vst [vmem:[#allocation12 + $0xa0] sm:$0xff] %v1354_v63  ;;  %1595 = vst [vmem:[#allocation12 + $0xb0] sm:$0xff] %v1397_v2  ;;  %v1356_v5 = vadd.f32 %v1355_v3, %v526_v52  ;;  %v1399_v6 = vadd.f32 %v1398_v4, %v534_v53 }
 0x2f7   :  { %1594 = vst [vmem:[#allocation12 + $0xa8] sm:$0xff] %v1356_v5  ;;  %1596 = vst [vmem:[#allocation12 + $0xb8] sm:$0xff] %v1399_v6 }
 0x30e   :  { %v1435_v13 = vpop.f32.mrf.mxu0  ;;  %v1478_v14 = vpop.f32.mrf.mxu1 }
 0x30f   :  { %v1436_v15 = vadd.f32 %v1435_v13, %v538_v9  ;;  %v1479_v16 = vadd.f32 %v1478_v14, %v546_v10 }
 0x310   :  { %v1437_v17 = vpop.f32.mrf.mxu0  ;;  %v1480_v18 = vpop.f32.mrf.mxu1 }
 0x311   :  { %1581 = vst [vmem:[#allocation12 + $0x40] sm:$0xff] %v1436_v15  ;;  %1583 = vst [vmem:[#allocation12 + $0x50] sm:$0xff] %v1479_v16  ;;  %v1438_v19 = vadd.f32 %v1437_v17, %v542_v11  ;;  %v1481_v20 = vadd.f32 %v1480_v18, %v550_v12 }
 0x312   :  { %v1439_v21 = vpop.f32.mrf.mxu0  ;;  %v1482_v23 = vpop.f32.mrf.mxu1 }
 0x313   :  { %1582 = vst [vmem:[#allocation12 + $0x48] sm:$0xff] %v1438_v19  ;;  %1584 = vst [vmem:[#allocation12 + $0x58] sm:$0xff] %v1481_v20  ;;  %v1440_v24 = vadd.f32 %v1439_v21, %v538_v9  ;;  %v1483_v25 = vadd.f32 %v1482_v23, %v546_v10 }
 0x314   :  { %v1441_v26 = vpop.f32.mrf.mxu0  ;;  %v1484_v28 = vpop.f32.mrf.mxu1 }
 0x315   :  { %1597 = vst [vmem:[#allocation12 + $0xc0] sm:$0xff] %v1440_v24  ;;  %1599 = vst [vmem:[#allocation12 + $0xd0] sm:$0xff] %v1483_v25  ;;  %v1442_v22 = vadd.f32 %v1441_v26, %v542_v11  ;;  %v1485_v27 = vadd.f32 %v1484_v28, %v550_v12 }
 0x317   :  { %1598 = vst [vmem:[#allocation12 + $0xc8] sm:$0xff] %v1442_v22  ;;  %1600 = vst [vmem:[#allocation12 + $0xd8] sm:$0xff] %v1485_v27 }
 0x32e   :  { %v1521_v33 = vpop.f32.mrf.mxu0  ;;  %v1564_v34 = vpop.f32.mrf.mxu1 }
 0x32f   :  { %v1522_v0 = vadd.f32 %v1521_v33, %v554_v30  ;;  %v1565_v1 = vadd.f32 %v1564_v34, %v562_v29 }
 0x330   :  { %v1523_v35 = vpop.f32.mrf.mxu0  ;;  %v1566_v36 = vpop.f32.mrf.mxu1 }
 0x331   :  { %1585 = vst [vmem:[#allocation12 + $0x60] sm:$0xff] %v1522_v0  ;;  %1587 = vst [vmem:[#allocation12 + $0x70] sm:$0xff] %v1565_v1  ;;  %v1524_v37 = vadd.f32 %v1523_v35, %v558_v31  ;;  %v1567_v38 = vadd.f32 %v1566_v36, %v566_v32 }
 0x332   :  { %v1525_v39 = vpop.f32.mrf.mxu0  ;;  %v1568_v40 = vpop.f32.mrf.mxu1 }
 0x333   :  { %1586 = vst [vmem:[#allocation12 + $0x68] sm:$0xff] %v1524_v37  ;;  %1588 = vst [vmem:[#allocation12 + $0x78] sm:$0xff] %v1567_v38  ;;  %v1526_v41 = vadd.f32 %v1525_v39, %v554_v30  ;;  %v1569_v42 = vadd.f32 %v1568_v40, %v562_v29 }
 0x334   :  { %v1527_v43 = vpop.f32.mrf.mxu0  ;;  %v1570_v44 = vpop.f32.mrf.mxu1 }
 0x335   :  { %1601 = vst [vmem:[#allocation12 + $0xe0] sm:$0xff] %v1526_v41  ;;  %1603 = vst [vmem:[#allocation12 + $0xf0] sm:$0xff] %v1569_v42  ;;  %v1528_v45 = vadd.f32 %v1527_v43, %v558_v31  ;;  %v1571_v46 = vadd.f32 %v1570_v44, %v566_v32 }
 0x337   :  { %1602 = vst [vmem:[#allocation12 + $0xe8] sm:$0xff] %v1528_v45  ;;  %1604 = vst [vmem:[#allocation12 + $0xf8] sm:$0xff] %v1571_v46 }
 0x338   :  { %2272 = shalt.err (!%p2269_p6)
}
 0x339   :  { %s2314_s24 = smov 2048   ;;  %s2315_s25 = smov 128  }
 0x33a   :  { %1616 = dma.vmem_to_hbm [thread:$0]  %s1611_s30, 4096, %s2650_s4, [#allocation9], %s2314_s24, %s2314_s24, %s2315_s25  }
 0x33b   :  { %2289 = dma.done.wait [#allocation9], 4096  }
 0x33c   :  { %2290 = vsyncadd [#allocation9], 4294963200 }
 0x33d   :  { %1620 = vsyncpa [#allocation8], 1 }
 0x33e   :  { %1621 = vsyncpa [#allocation11], 1 }
 0x33f   :  { %1622 = vsyncpa [#allocation9], 1 }
 0x340   :  { %1623 = vsyncmov [#allocation4] }
 0x343   :  { %s1624_s8 = vpop.sfrf %1623 }
 0x344   :  { %p1823_p7 = scmp.ne.s32.totalorder %s1624_s8, 0 }
 0x346   :  { %1628 = shalt.err (%p1823_p7)  }

</bundles_post_ra>
